<compile_context>
chip_gen: v7x
topology: tpu7x:2x2x1
jax: 0.10.0
libtpu: 0.0.40
codegen_flags: <defaults>
</compile_context>

<pallas_src>
import functools

import jax
import jax.numpy as jnp
from jax import lax
from jax.experimental import pallas as pl
from jax.experimental.pallas import tpu as pltpu


def _vmem_limit_bytes():
    """~3/4 of this generation's physical VMEM (48 MiB on v7x, 96 MiB on v5e/v6e)."""
    cap = 64 * 1024 * 1024
    try:
        cap = int(pltpu.get_tpu_info().vmem_capacity_bytes)
    except Exception:
        pass
    return int(min(cap * 3 // 4, 100 * 1024 * 1024))


def _layernorm_f32(y, gamma, beta, eps):
    mean = jnp.mean(y, axis=-1, keepdims=True)
    var = jnp.mean(jnp.square(y - mean), axis=-1, keepdims=True)
    y = (y - mean) * lax.rsqrt(var + eps)
    return y * gamma.astype(jnp.float32) + beta.astype(jnp.float32)


# ---------------- fused transformer-layer body (runs on one batch element) ----------


def _layer_body(xv, wqkv_ref, bqkv_ref, wo_ref, bo_ref, w1_ref, b1_ref, w2_ref,
                b2_ref, g1_ref, be1_ref, g2_ref, be2_ref, attn_ref, *,
                num_heads, eps):
    """One post-LN transformer encoder layer on a resident (T, D) activation."""
    dtype = xv.dtype
    T, D = xv.shape
    head_dim = D // num_heads
    x_f32 = xv.astype(jnp.float32)

    # Fused QKV projection; 1/sqrt(head_dim) already folded into the Q columns of wqkv.
    qkv = (jnp.dot(xv, wqkv_ref[...], preferred_element_type=jnp.float32)
           + bqkv_ref[...].astype(jnp.float32)).astype(dtype)          # (T, 3D)

    # Multi-head self-attention.  Heads are static column slices; each head's output is
    # written directly into the attn scratch slice (no concatenate, no k.T transpose).
    for h in range(num_heads):
        c0 = h * head_dim
        q = qkv[:, c0:c0 + head_dim]
        k = qkv[:, D + c0:D + c0 + head_dim]
        v = qkv[:, 2 * D + c0:2 * D + c0 + head_dim]
        s = lax.dot_general(q, k, (((1,), (1,)), ((), ())),
                            preferred_element_type=jnp.float32)        # (T, T) NT matmul
        s = s - jnp.max(s, axis=-1, keepdims=True)
        p = jnp.exp(s)
        p = p / jnp.sum(p, axis=-1, keepdims=True)
        o_h = jnp.dot(p.astype(dtype), v, preferred_element_type=jnp.float32)
        attn_ref[:, c0:c0 + head_dim] = o_h.astype(dtype)

    # Output projection + residual + LN1 (f32 epilogue).
    y = jnp.dot(attn_ref[...], wo_ref[...], preferred_element_type=jnp.float32)
    y = y + bo_ref[...].astype(jnp.float32) + x_f32
    x1_f32 = _layernorm_f32(y, g1_ref[...], be1_ref[...], eps)
    x1 = x1_f32.astype(dtype)

    # FFN (w1 + ReLU, w2) + residual + LN2; the (T, d_ff) intermediate never leaves VMEM.
    hmid = jnp.dot(x1, w1_ref[...], preferred_element_type=jnp.float32)
    hmid = jnp.maximum(hmid + b1_ref[...].astype(jnp.float32), 0.0).astype(dtype)
    y2 = jnp.dot(hmid, w2_ref[...], preferred_element_type=jnp.float32)
    y2 = y2 + b2_ref[...].astype(jnp.float32) + x1_f32
    out_f32 = _layernorm_f32(y2, g2_ref[...], be2_ref[...], eps)
    return out_f32.astype(dtype)


# ---------------- fused stack kernels ----------------


def _encoder_stack_kernel(x_ref, wqkv_ref, bqkv_ref, wo_ref, bo_ref, w1_ref, b1_ref,
                          w2_ref, b2_ref, g1_ref, be1_ref, g2_ref, be2_ref,
                          out_ref, act_ref, attn_ref, *, num_heads, eps):
    l = pl.program_id(1)

    @pl.when(l == 0)
    def _():
        act_ref[...] = x_ref[...]

    new_x = _layer_body(act_ref[...], wqkv_ref, bqkv_ref, wo_ref, bo_ref, w1_ref,
                        b1_ref, w2_ref, b2_ref, g1_ref, be1_ref, g2_ref, be2_ref,
                        attn_ref, num_heads=num_heads, eps=eps)
    act_ref[...] = new_x

    @pl.when(l == pl.num_programs(1) - 1)
    def _():
        out_ref[...] = new_x


def _predictor_stack_kernel(x_ref, wqkv_ref, bqkv_ref, wo_ref, bo_ref, w1_ref, b1_ref,
                            w2_ref, b2_ref, g1_ref, be1_ref, g2_ref, be2_ref,
                            hw_ref, hb_ref, head_ref, act_ref, attn_ref, *,
                            num_heads, eps, head_mode, max_duration):
    l = pl.program_id(1)

    @pl.when(l == 0)
    def _():
        act_ref[...] = x_ref[...]

    new_x = _layer_body(act_ref[...], wqkv_ref, bqkv_ref, wo_ref, bo_ref, w1_ref,
                        b1_ref, w2_ref, b2_ref, g1_ref, be1_ref, g2_ref, be2_ref,
                        attn_ref, num_heads=num_heads, eps=eps)
    act_ref[...] = new_x

    @pl.when(l == pl.num_programs(1) - 1)
    def _():
        # Linear(D, 1) head as a (1, D) x (T, D)^T NT matmul -> lane-dense (1, T) row.
        z = lax.dot_general(hw_ref[...], new_x, (((1,), (1,)), ((), ())),
                            preferred_element_type=jnp.float32)
        z = z + hb_ref[...].astype(jnp.float32)
        if head_mode == "duration":
            z = jnp.clip(jnp.exp(z) - 1.0, 0.0, max_duration)
        head_ref[...] = z                                   # float32 regardless of dtype


# ---------------- pallas_call wrappers ----------------


def _stack_in_specs(D, F):
    w = lambda b, l: (l, 0, 0)
    return [
        pl.BlockSpec((None, D, 3 * D), w),   # wqkv
        pl.BlockSpec((None, 1, 3 * D), w),   # bqkv
        pl.BlockSpec((None, D, D), w),       # wo
        pl.BlockSpec((None, 1, D), w),       # bo
        pl.BlockSpec((None, D, F), w),       # w1
        pl.BlockSpec((None, 1, F), w),       # b1
        pl.BlockSpec((None, F, D), w),       # w2
        pl.BlockSpec((None, 1, D), w),       # b2
        pl.BlockSpec((None, 1, D), w),       # ln1_g
        pl.BlockSpec((None, 1, D), w),       # ln1_b
        pl.BlockSpec((None, 1, D), w),       # ln2_g
        pl.BlockSpec((None, 1, D), w),       # ln2_b
    ]


def _stack_weight_operands(st):
    return (st['wqkv'], st['bqkv'], st['wo'], st['bo'], st['w1'], st['b1'],
            st['w2'], st['b2'], st['ln1_g'], st['ln1_b'], st['ln2_g'], st['ln2_b'])


def encoder_stack(x, stacked, num_heads, *, eps=1e-5):
    B, T, D = x.shape
    L, _, F = stacked['w1'].shape
    x_spec = pl.BlockSpec((None, T, D), lambda b, l: (b, 0, 0))
    return pl.pallas_call(
        functools.partial(_encoder_stack_kernel, num_heads=num_heads, eps=eps),
        out_shape=jax.ShapeDtypeStruct((B, T, D), x.dtype),
        grid=(B, L),
        in_specs=[x_spec] + _stack_in_specs(D, F),
        out_specs=pl.BlockSpec((None, T, D), lambda b, l: (b, 0, 0)),
        scratch_shapes=[pltpu.VMEM((T, D), x.dtype),      # resident activation
                        pltpu.VMEM((T, D), x.dtype)],     # attention head outputs
        compiler_params=pltpu.CompilerParams(
            dimension_semantics=("parallel", "arbitrary"),
            vmem_limit_bytes=_vmem_limit_bytes()),
    )(x, *_stack_weight_operands(stacked))


def predictor_stack(x, stacked, num_heads, *, head_mode, max_duration=100.0, eps=1e-5):
    B, T, D = x.shape
    L, _, F = stacked['w1'].shape
    x_spec = pl.BlockSpec((None, T, D), lambda b, l: (b, 0, 0))
    head_specs = [pl.BlockSpec((1, D), lambda b, l: (0, 0)),
                  pl.BlockSpec((1, 1), lambda b, l: (0, 0))]
    out = pl.pallas_call(
        functools.partial(_predictor_stack_kernel, num_heads=num_heads, eps=eps,
                          head_mode=head_mode, max_duration=max_duration),
        out_shape=jax.ShapeDtypeStruct((B, 1, T), jnp.float32),
        grid=(B, L),
        in_specs=[x_spec] + _stack_in_specs(D, F) + head_specs,
        out_specs=pl.BlockSpec((None, 1, T), lambda b, l: (b, 0, 0)),
        scratch_shapes=[pltpu.VMEM((T, D), x.dtype),
                        pltpu.VMEM((T, D), x.dtype)],
        compiler_params=pltpu.CompilerParams(
            dimension_semantics=("parallel", "arbitrary"),
            vmem_limit_bytes=_vmem_limit_bytes()),
    )(x, *_stack_weight_operands(stacked), stacked['head_w'], stacked['head_b'])
    return out.reshape(B, T)


# ---------------- model assembly ----------------


def inference_encoder_forward(x, prepped, *, max_duration=100.0):
    num_heads = prepped['num_heads']
    enc = encoder_stack(x, prepped['enc'], num_heads)
    durations = predictor_stack(enc, prepped['dur'], num_heads,
                                head_mode="duration", max_duration=max_duration)
    pitch = predictor_stack(enc, prepped['pitch'], num_heads, head_mode="linear")
    return enc, durations, pitch


# ---------------- parameter prep: stack per-layer params, fold attention scale -------


def _stack_layer_params(layers, num_heads):
    d_model = layers[0]['wqkv'].shape[0]
    scale = float(d_model // num_heads) ** -0.5
    col_scale = jnp.concatenate([jnp.full((d_model,), scale),
                                 jnp.ones((2 * d_model,))])

    def stk(name, shape=None, fold=False):
        arrs = []
        for lp in layers:
            a = lp[name]
            if fold:
                a = a * col_scale.astype(a.dtype)
            if shape is not None:
                a = a.reshape(shape)
            arrs.append(a)
        return jnp.stack(arrs, axis=0)

    return dict(
        wqkv=stk('wqkv', fold=True), bqkv=stk('bqkv', (1, -1), fold=True),
        wo=stk('wo'), bo=stk('bo', (1, -1)),
        w1=stk('w1'), b1=stk('b1', (1, -1)),
        w2=stk('w2'), b2=stk('b2', (1, -1)),
        ln1_g=stk('ln1_g', (1, -1)), ln1_b=stk('ln1_b', (1, -1)),
        ln2_g=stk('ln2_g', (1, -1)), ln2_b=stk('ln2_b', (1, -1)),
    )


def prepare_inference_params(params):
    num_heads = params['num_heads']
    prepped = dict(num_heads=num_heads)
    prepped['enc'] = _stack_layer_params(params['enc_layers'], num_heads)
    for name in ('dur', 'pitch'):
        st = _stack_layer_params(params[name]['layers'], num_heads)
        st['head_w'] = params[name]['head_w'].reshape(1, -1)
        st['head_b'] = params[name]['head_b'].reshape(1, 1)
        prepped[name] = st
    return prepped


# ---------------- deterministic synthetic parameters ----------------


def init_inference_encoder_params(key, *, d_model, num_heads, d_ff,
                                  num_enc_layers, num_dur_layers, num_pitch_layers):
    scale = 0.1

    def nrm(k, shape):
        return scale * jax.random.normal(k, shape, jnp.float32)

    def make_layer(k):
        lk = jax.random.split(k, 8)
        return dict(
            wqkv=nrm(lk[0], (d_model, 3 * d_model)), bqkv=nrm(lk[1], (3 * d_model,)),
            wo=nrm(lk[2], (d_model, d_model)), bo=nrm(lk[3], (d_model,)),
            w1=nrm(lk[4], (d_model, d_ff)), b1=nrm(lk[5], (d_ff,)),
            w2=nrm(lk[6], (d_ff, d_model)), b2=nrm(lk[7], (d_model,)),
            ln1_g=jnp.ones((d_model,), jnp.float32),
            ln1_b=jnp.zeros((d_model,), jnp.float32),
            ln2_g=jnp.ones((d_model,), jnp.float32),
            ln2_b=jnp.zeros((d_model,), jnp.float32),
        )

    n_layers = num_enc_layers + num_dur_layers + num_pitch_layers
    keys = jax.random.split(key, n_layers + 4)
    enc = [make_layer(keys[i]) for i in range(num_enc_layers)]
    off = num_enc_layers
    dur_layers = [make_layer(keys[off + i]) for i in range(num_dur_layers)]
    off += num_dur_layers
    pitch_layers = [make_layer(keys[off + i]) for i in range(num_pitch_layers)]
    dur = dict(layers=dur_layers,
               head_w=nrm(keys[n_layers], (d_model, 1)),
               head_b=nrm(keys[n_layers + 1], (1,)))
    pitch = dict(layers=pitch_layers,
                 head_w=nrm(keys[n_layers + 2], (d_model, 1)),
                 head_b=nrm(keys[n_layers + 3], (1,)))
    return dict(enc_layers=enc, dur=dur, pitch=pitch, num_heads=num_heads)


# ---------------- pure-JAX reference (for correctness check) ----------------


def _ref_layernorm(x, g, b, eps=1e-5):
    m = jnp.mean(x, -1, keepdims=True)
    v = jnp.mean((x - m) ** 2, -1, keepdims=True)
    return (x - m) / jnp.sqrt(v + eps) * g + b


def _ref_layer(x, p, num_heads):
    B, T, D = x.shape
    dh = D // num_heads
    qkv = x @ p['wqkv'] + p['bqkv']
    q, k, v = jnp.split(qkv, 3, axis=-1)

    def split_heads(t):
        return t.reshape(B, T, num_heads, dh).transpose(0, 2, 1, 3)

    q, k, v = split_heads(q), split_heads(k), split_heads(v)
    s = jnp.einsum('bhtd,bhsd->bhts', q, k) / jnp.sqrt(dh)
    a = jax.nn.softmax(s, axis=-1)
    o = jnp.einsum('bhts,bhsd->bhtd', a, v).transpose(0, 2, 1, 3).reshape(B, T, D)
    x = _ref_layernorm(x + o @ p['wo'] + p['bo'], p['ln1_g'], p['ln1_b'])
    h = jnp.maximum(x @ p['w1'] + p['b1'], 0.0)
    x = _ref_layernorm(x + h @ p['w2'] + p['b2'], p['ln2_g'], p['ln2_b'])
    return x


def _ref_predictor(x, pp, num_heads):
    for p in pp['layers']:
        x = _ref_layer(x, p, num_heads)
    return (x @ pp['head_w'] + pp['head_b'])[..., 0]


def ref_forward(x, params, *, max_duration=100.0):
    num_heads = params['num_heads']
    for p in params['enc_layers']:
        x = _ref_layer(x, p, num_heads)
    dur = jnp.clip(jnp.exp(_ref_predictor(x, params['dur'], num_heads)) - 1.0,
                   0.0, max_duration)
    pitch = _ref_predictor(x, params['pitch'], num_heads)
    return x, dur, pitch


if __name__ == "__main__":
    B, T = 2, 16                # batch, token sequence length
    D, H, F = 64, 4, 128        # encoder dim, heads, ffn dim
    L_ENC, L_DUR, L_PITCH = 2, 1, 1

    key = jax.random.PRNGKey(0)
    kx, kparam = jax.random.split(key)
    x = jax.random.normal(kx, (B, T, D), jnp.float32)
    params = init_inference_encoder_params(
        kparam, d_model=D, num_heads=H, d_ff=F,
        num_enc_layers=L_ENC, num_dur_layers=L_DUR, num_pitch_layers=L_PITCH)
    prepped = prepare_inference_params(params)

    enc_out, dur_out, pitch_out = inference_encoder_forward(x, prepped)
    jax.block_until_ready((enc_out, dur_out, pitch_out))

    ref_enc, ref_dur, ref_pitch = ref_forward(x, params)
    assert enc_out.shape == (B, T, D), enc_out.shape
    assert dur_out.shape == (B, T), dur_out.shape
    assert pitch_out.shape == (B, T), pitch_out.shape
    for got, ref in ((enc_out, ref_enc), (dur_out, ref_dur), (pitch_out, ref_pitch)):
        err = float(jnp.max(jnp.abs(got.astype(jnp.float32) - ref)))
        assert bool(jnp.allclose(got.astype(jnp.float32), ref,
                                 rtol=1e-2, atol=1e-2)), f"max abs err {err}"

    # bf16 weights/activations path (bf16 MXU, f32 accumulation, f32 heads) -- smoke test.
    def _to_bf16(a):
        return a.astype(jnp.bfloat16) if hasattr(a, "dtype") and a.dtype == jnp.float32 else a

    params_bf16 = jax.tree_util.tree_map(_to_bf16, params)
    prepped_bf16 = prepare_inference_params(params_bf16)
    out_bf16 = inference_encoder_forward(x.astype(jnp.bfloat16), prepped_bf16)
    out_bf16 = jax.block_until_ready(out_bf16)
    assert all(bool(jnp.all(jnp.isfinite(o.astype(jnp.float32)))) for o in out_bf16)

    print("KERNEL_OK")
</pallas_src>

<mosaic_0001>
module attributes {stable_mosaic.version = 11 : i64} {
  func.func @_encoder_stack_kernel(%arg0: i32, %arg1: i32, %arg2: memref<1x16x64xf32, #tpu.memory_space<vmem>>, %arg3: memref<1x64x192xf32, #tpu.memory_space<vmem>>, %arg4: memref<1x1x192xf32, #tpu.memory_space<vmem>>, %arg5: memref<1x64x64xf32, #tpu.memory_space<vmem>>, %arg6: memref<1x1x64xf32, #tpu.memory_space<vmem>>, %arg7: memref<1x64x128xf32, #tpu.memory_space<vmem>>, %arg8: memref<1x1x128xf32, #tpu.memory_space<vmem>>, %arg9: memref<1x128x64xf32, #tpu.memory_space<vmem>>, %arg10: memref<1x1x64xf32, #tpu.memory_space<vmem>>, %arg11: memref<1x1x64xf32, #tpu.memory_space<vmem>>, %arg12: memref<1x1x64xf32, #tpu.memory_space<vmem>>, %arg13: memref<1x1x64xf32, #tpu.memory_space<vmem>>, %arg14: memref<1x1x64xf32, #tpu.memory_space<vmem>>, %arg15: memref<1x16x64xf32, #tpu.memory_space<vmem>>, %arg16: memref<16x64xf32, #tpu.memory_space<vmem>>, %arg17: memref<16x64xf32, #tpu.memory_space<vmem>>) attributes {dimension_semantics = [#tpu.dimension_semantics<parallel>, #tpu.dimension_semantics<arbitrary>], iteration_bounds = array<i64: 2, 2>, scalar_prefetch = 0 : i64, scratch_operands = 2 : i64, tpu.core_type = #tpu.core_type<tc>, window_params = [{transform_indices = @transform_0, window_bounds = array<i64: 1, 16, 64>}, {transform_indices = @transform_1, window_bounds = array<i64: 1, 64, 192>}, {transform_indices = @transform_2, window_bounds = array<i64: 1, 1, 192>}, {transform_indices = @transform_3, window_bounds = array<i64: 1, 64, 64>}, {transform_indices = @transform_4, window_bounds = array<i64: 1, 1, 64>}, {transform_indices = @transform_5, window_bounds = array<i64: 1, 64, 128>}, {transform_indices = @transform_6, window_bounds = array<i64: 1, 1, 128>}, {transform_indices = @transform_7, window_bounds = array<i64: 1, 128, 64>}, {transform_indices = @transform_8, window_bounds = array<i64: 1, 1, 64>}, {transform_indices = @transform_9, window_bounds = array<i64: 1, 1, 64>}, {transform_indices = @transform_10, window_bounds = array<i64: 1, 1, 64>}, {transform_indices = @transform_11, window_bounds = array<i64: 1, 1, 64>}, {transform_indices = @transform_12, window_bounds = array<i64: 1, 1, 64>}, {transform_indices = @transform_13, window_bounds = array<i64: 1, 16, 64>}]} {
    %c0_i32 = arith.constant 0 : i32
    %0 = arith.cmpi eq, %arg1, %c0_i32 : i32
    %1 = arith.extui %0 : i1 to i32
    %c0_i32_0 = arith.constant 0 : i32
    %2 = arith.cmpi ne, %1, %c0_i32_0 : i32
    scf.if %2 {
      %c0_78 = arith.constant 0 : index
      %c0_79 = arith.constant 0 : index
      %c0_80 = arith.constant 0 : index
      %153 = vector.load %arg2[%c0_78, %c0_79, %c0_80] : memref<1x16x64xf32, #tpu.memory_space<vmem>>, vector<1x16x64xf32>
      %154 = vector.shape_cast %153 : vector<1x16x64xf32> to vector<16x64xf32>
      %c0_81 = arith.constant 0 : index
      %c0_82 = arith.constant 0 : index
      %155 = vector.load %arg16[%c0_81, %c0_82] : memref<16x64xf32, #tpu.memory_space<vmem>>, vector<16x64xf32>
      tpu.vector_store %arg16[%c0_81, %c0_82], %154 {strides = array<i32>} : memref<16x64xf32, #tpu.memory_space<vmem>>, vector<16x64xf32>,
    } else {
    }
    %c0 = arith.constant 0 : index
    %c0_1 = arith.constant 0 : index
    %3 = vector.load %arg16[%c0, %c0_1] : memref<16x64xf32, #tpu.memory_space<vmem>>, vector<16x64xf32>
    %c0_2 = arith.constant 0 : index
    %c0_3 = arith.constant 0 : index
    %c0_4 = arith.constant 0 : index
    %4 = vector.load %arg3[%c0_2, %c0_3, %c0_4] : memref<1x64x192xf32, #tpu.memory_space<vmem>>, vector<1x64x192xf32>
    %5 = vector.shape_cast %4 : vector<1x64x192xf32> to vector<64x192xf32>
    %cst = arith.constant dense<0.000000e+00> : vector<16x192xf32>
    %6 = tpu.matmul %3, %5, %cst {dimension_numbers = #tpu.dot_dimension_numbers<[1], [0], [0], [1], [0, 0, 1, 1], [], []>} : vector<16x64xf32>, vector<64x192xf32>, vector<16x192xf32> -> vector<16x192xf32>
    %c0_5 = arith.constant 0 : index
    %c0_6 = arith.constant 0 : index
    %c0_7 = arith.constant 0 : index
    %7 = vector.load %arg4[%c0_5, %c0_6, %c0_7] : memref<1x1x192xf32, #tpu.memory_space<vmem>>, vector<1x1x192xf32>
    %8 = vector.shape_cast %7 : vector<1x1x192xf32> to vector<1x192xf32>
    %9 = vector.broadcast %8 : vector<1x192xf32> to vector<16x192xf32>
    %10 = arith.addf %6, %9 : vector<16x192xf32>
    %11 = vector.extract_strided_slice %10 {offsets = [0, 0], sizes = [16, 16], strides = [1, 1]} : vector<16x192xf32> to vector<16x16xf32>
    %12 = vector.extract_strided_slice %10 {offsets = [0, 64], sizes = [16, 16], strides = [1, 1]} : vector<16x192xf32> to vector<16x16xf32>
    %13 = vector.extract_strided_slice %10 {offsets = [0, 128], sizes = [16, 16], strides = [1, 1]} : vector<16x192xf32> to vector<16x16xf32>
    %cst_8 = arith.constant dense<0.000000e+00> : vector<16x16xf32>
    %14 = tpu.matmul %11, %12, %cst_8 {dimension_numbers = #tpu.dot_dimension_numbers<[1], [1], [0], [0], [0, 0, 1, 0], [], []>} : vector<16x16xf32>, vector<16x16xf32>, vector<16x16xf32> -> vector<16x16xf32>
    %cst_9 = arith.constant dense<0xFF800000> : vector<16xf32>
    %15 = vector.multi_reduction <maximumf>, %14, %cst_9 [1] : vector<16x16xf32> to vector<16xf32>
    %16 = vector.shape_cast %15 : vector<16xf32> to vector<16x1xf32>
    %17 = vector.broadcast %16 : vector<16x1xf32> to vector<16x16xf32>
    %18 = arith.subf %14, %17 : vector<16x16xf32>
    %19 = math.exp %18 : vector<16x16xf32>
    %cst_10 = arith.constant dense<0.000000e+00> : vector<16xf32>
    %20 = vector.multi_reduction <add>, %19, %cst_10 [1] : vector<16x16xf32> to vector<16xf32>
    %21 = vector.shape_cast %20 : vector<16xf32> to vector<16x1xf32>
    %22 = vector.broadcast %21 : vector<16x1xf32> to vector<16x16xf32>
    %23 = arith.divf %19, %22 : vector<16x16xf32>
    %cst_11 = arith.constant dense<0.000000e+00> : vector<16x16xf32>
    %24 = tpu.matmul %23, %13, %cst_11 {dimension_numbers = #tpu.dot_dimension_numbers<[1], [0], [0], [1], [0, 0, 1, 1], [], []>} : vector<16x16xf32>, vector<16x16xf32>, vector<16x16xf32> -> vector<16x16xf32>
    %c0_12 = arith.constant 0 : index
    %c0_13 = arith.constant 0 : index
    %25 = vector.load %arg17[%c0_12, %c0_13] : memref<16x64xf32, #tpu.memory_space<vmem>>, vector<16x16xf32>
    tpu.vector_store %arg17[%c0_12, %c0_13], %24 {strides = array<i32>} : memref<16x64xf32, #tpu.memory_space<vmem>>, vector<16x16xf32>,
    %26 = vector.extract_strided_slice %10 {offsets = [0, 16], sizes = [16, 16], strides = [1, 1]} : vector<16x192xf32> to vector<16x16xf32>
    %27 = vector.extract_strided_slice %10 {offsets = [0, 80], sizes = [16, 16], strides = [1, 1]} : vector<16x192xf32> to vector<16x16xf32>
    %28 = vector.extract_strided_slice %10 {offsets = [0, 144], sizes = [16, 16], strides = [1, 1]} : vector<16x192xf32> to vector<16x16xf32>
    %cst_14 = arith.constant dense<0.000000e+00> : vector<16x16xf32>
    %29 = tpu.matmul %26, %27, %cst_14 {dimension_numbers = #tpu.dot_dimension_numbers<[1], [1], [0], [0], [0, 0, 1, 0], [], []>} : vector<16x16xf32>, vector<16x16xf32>, vector<16x16xf32> -> vector<16x16xf32>
    %cst_15 = arith.constant dense<0xFF800000> : vector<16xf32>
    %30 = vector.multi_reduction <maximumf>, %29, %cst_15 [1] : vector<16x16xf32> to vector<16xf32>
    %31 = vector.shape_cast %30 : vector<16xf32> to vector<16x1xf32>
    %32 = vector.broadcast %31 : vector<16x1xf32> to vector<16x16xf32>
    %33 = arith.subf %29, %32 : vector<16x16xf32>
    %34 = math.exp %33 : vector<16x16xf32>
    %cst_16 = arith.constant dense<0.000000e+00> : vector<16xf32>
    %35 = vector.multi_reduction <add>, %34, %cst_16 [1] : vector<16x16xf32> to vector<16xf32>
    %36 = vector.shape_cast %35 : vector<16xf32> to vector<16x1xf32>
    %37 = vector.broadcast %36 : vector<16x1xf32> to vector<16x16xf32>
    %38 = arith.divf %34, %37 : vector<16x16xf32>
    %cst_17 = arith.constant dense<0.000000e+00> : vector<16x16xf32>
    %39 = tpu.matmul %38, %28, %cst_17 {dimension_numbers = #tpu.dot_dimension_numbers<[1], [0], [0], [1], [0, 0, 1, 1], [], []>} : vector<16x16xf32>, vector<16x16xf32>, vector<16x16xf32> -> vector<16x16xf32>
    %c0_18 = arith.constant 0 : index
    %c16 = arith.constant 16 : index
    %40 = vector.load %arg17[%c0_18, %c16] : memref<16x64xf32, #tpu.memory_space<vmem>>, vector<16x16xf32>
    tpu.vector_store %arg17[%c0_18, %c16], %39 {strides = array<i32>} : memref<16x64xf32, #tpu.memory_space<vmem>>, vector<16x16xf32>,
    %41 = vector.extract_strided_slice %10 {offsets = [0, 32], sizes = [16, 16], strides = [1, 1]} : vector<16x192xf32> to vector<16x16xf32>
    %42 = vector.extract_strided_slice %10 {offsets = [0, 96], sizes = [16, 16], strides = [1, 1]} : vector<16x192xf32> to vector<16x16xf32>
    %43 = vector.extract_strided_slice %10 {offsets = [0, 160], sizes = [16, 16], strides = [1, 1]} : vector<16x192xf32> to vector<16x16xf32>
    %cst_19 = arith.constant dense<0.000000e+00> : vector<16x16xf32>
    %44 = tpu.matmul %41, %42, %cst_19 {dimension_numbers = #tpu.dot_dimension_numbers<[1], [1], [0], [0], [0, 0, 1, 0], [], []>} : vector<16x16xf32>, vector<16x16xf32>, vector<16x16xf32> -> vector<16x16xf32>
    %cst_20 = arith.constant dense<0xFF800000> : vector<16xf32>
    %45 = vector.multi_reduction <maximumf>, %44, %cst_20 [1] : vector<16x16xf32> to vector<16xf32>
    %46 = vector.shape_cast %45 : vector<16xf32> to vector<16x1xf32>
    %47 = vector.broadcast %46 : vector<16x1xf32> to vector<16x16xf32>
    %48 = arith.subf %44, %47 : vector<16x16xf32>
    %49 = math.exp %48 : vector<16x16xf32>
    %cst_21 = arith.constant dense<0.000000e+00> : vector<16xf32>
    %50 = vector.multi_reduction <add>, %49, %cst_21 [1] : vector<16x16xf32> to vector<16xf32>
    %51 = vector.shape_cast %50 : vector<16xf32> to vector<16x1xf32>
    %52 = vector.broadcast %51 : vector<16x1xf32> to vector<16x16xf32>
    %53 = arith.divf %49, %52 : vector<16x16xf32>
    %cst_22 = arith.constant dense<0.000000e+00> : vector<16x16xf32>
    %54 = tpu.matmul %53, %43, %cst_22 {dimension_numbers = #tpu.dot_dimension_numbers<[1], [0], [0], [1], [0, 0, 1, 1], [], []>} : vector<16x16xf32>, vector<16x16xf32>, vector<16x16xf32> -> vector<16x16xf32>
    %c0_23 = arith.constant 0 : index
    %c32 = arith.constant 32 : index
    %55 = vector.load %arg17[%c0_23, %c32] : memref<16x64xf32, #tpu.memory_space<vmem>>, vector<16x16xf32>
    tpu.vector_store %arg17[%c0_23, %c32], %54 {strides = array<i32>} : memref<16x64xf32, #tpu.memory_space<vmem>>, vector<16x16xf32>,
    %56 = vector.extract_strided_slice %10 {offsets = [0, 48], sizes = [16, 16], strides = [1, 1]} : vector<16x192xf32> to vector<16x16xf32>
    %57 = vector.extract_strided_slice %10 {offsets = [0, 112], sizes = [16, 16], strides = [1, 1]} : vector<16x192xf32> to vector<16x16xf32>
    %58 = vector.extract_strided_slice %10 {offsets = [0, 176], sizes = [16, 16], strides = [1, 1]} : vector<16x192xf32> to vector<16x16xf32>
    %cst_24 = arith.constant dense<0.000000e+00> : vector<16x16xf32>
    %59 = tpu.matmul %56, %57, %cst_24 {dimension_numbers = #tpu.dot_dimension_numbers<[1], [1], [0], [0], [0, 0, 1, 0], [], []>} : vector<16x16xf32>, vector<16x16xf32>, vector<16x16xf32> -> vector<16x16xf32>
    %cst_25 = arith.constant dense<0xFF800000> : vector<16xf32>
    %60 = vector.multi_reduction <maximumf>, %59, %cst_25 [1] : vector<16x16xf32> to vector<16xf32>
    %61 = vector.shape_cast %60 : vector<16xf32> to vector<16x1xf32>
    %62 = vector.broadcast %61 : vector<16x1xf32> to vector<16x16xf32>
    %63 = arith.subf %59, %62 : vector<16x16xf32>
    %64 = math.exp %63 : vector<16x16xf32>
    %cst_26 = arith.constant dense<0.000000e+00> : vector<16xf32>
    %65 = vector.multi_reduction <add>, %64, %cst_26 [1] : vector<16x16xf32> to vector<16xf32>
    %66 = vector.shape_cast %65 : vector<16xf32> to vector<16x1xf32>
    %67 = vector.broadcast %66 : vector<16x1xf32> to vector<16x16xf32>
    %68 = arith.divf %64, %67 : vector<16x16xf32>
    %cst_27 = arith.constant dense<0.000000e+00> : vector<16x16xf32>
    %69 = tpu.matmul %68, %58, %cst_27 {dimension_numbers = #tpu.dot_dimension_numbers<[1], [0], [0], [1], [0, 0, 1, 1], [], []>} : vector<16x16xf32>, vector<16x16xf32>, vector<16x16xf32> -> vector<16x16xf32>
    %c0_28 = arith.constant 0 : index
    %c48 = arith.constant 48 : index
    %70 = vector.load %arg17[%c0_28, %c48] : memref<16x64xf32, #tpu.memory_space<vmem>>, vector<16x16xf32>
    tpu.vector_store %arg17[%c0_28, %c48], %69 {strides = array<i32>} : memref<16x64xf32, #tpu.memory_space<vmem>>, vector<16x16xf32>,
    %c0_29 = arith.constant 0 : index
    %c0_30 = arith.constant 0 : index
    %71 = vector.load %arg17[%c0_29, %c0_30] : memref<16x64xf32, #tpu.memory_space<vmem>>, vector<16x64xf32>
    %c0_31 = arith.constant 0 : index
    %c0_32 = arith.constant 0 : index
    %c0_33 = arith.constant 0 : index
    %72 = vector.load %arg5[%c0_31, %c0_32, %c0_33] : memref<1x64x64xf32, #tpu.memory_space<vmem>>, vector<1x64x64xf32>
    %73 = vector.shape_cast %72 : vector<1x64x64xf32> to vector<64x64xf32>
    %cst_34 = arith.constant dense<0.000000e+00> : vector<16x64xf32>
    %74 = tpu.matmul %71, %73, %cst_34 {dimension_numbers = #tpu.dot_dimension_numbers<[1], [0], [0], [1], [0, 0, 1, 1], [], []>} : vector<16x64xf32>, vector<64x64xf32>, vector<16x64xf32> -> vector<16x64xf32>
    %c0_35 = arith.constant 0 : index
    %c0_36 = arith.constant 0 : index
    %c0_37 = arith.constant 0 : index
    %75 = vector.load %arg6[%c0_35, %c0_36, %c0_37] : memref<1x1x64xf32, #tpu.memory_space<vmem>>, vector<1x1x64xf32>
    %76 = vector.shape_cast %75 : vector<1x1x64xf32> to vector<1x64xf32>
    %77 = vector.broadcast %76 : vector<1x64xf32> to vector<16x64xf32>
    %78 = arith.addf %74, %77 : vector<16x64xf32>
    %79 = arith.addf %78, %3 : vector<16x64xf32>
    %c0_38 = arith.constant 0 : index
    %c0_39 = arith.constant 0 : index
    %c0_40 = arith.constant 0 : index
    %80 = vector.load %arg11[%c0_38, %c0_39, %c0_40] : memref<1x1x64xf32, #tpu.memory_space<vmem>>, vector<1x1x64xf32>
    %81 = vector.shape_cast %80 : vector<1x1x64xf32> to vector<1x64xf32>
    %c0_41 = arith.constant 0 : index
    %c0_42 = arith.constant 0 : index
    %c0_43 = arith.constant 0 : index
    %82 = vector.load %arg12[%c0_41, %c0_42, %c0_43] : memref<1x1x64xf32, #tpu.memory_space<vmem>>, vector<1x1x64xf32>
    %83 = vector.shape_cast %82 : vector<1x1x64xf32> to vector<1x64xf32>
    %cst_44 = arith.constant dense<0.000000e+00> : vector<16xf32>
    %84 = vector.multi_reduction <add>, %79, %cst_44 [1] : vector<16x64xf32> to vector<16xf32>
    %85 = vector.shape_cast %84 : vector<16xf32> to vector<16x1xf32>
    %cst_45 = arith.constant 6.400000e+01 : f32
    %86 = vector.broadcast %cst_45 : f32 to vector<16x1xf32>
    %87 = arith.divf %85, %86 : vector<16x1xf32>
    %88 = vector.broadcast %87 : vector<16x1xf32> to vector<16x64xf32>
    %89 = arith.subf %79, %88 : vector<16x64xf32>
    %90 = arith.mulf %89, %89 : vector<16x64xf32>
    %cst_46 = arith.constant dense<0.000000e+00> : vector<16xf32>
    %91 = vector.multi_reduction <add>, %90, %cst_46 [1] : vector<16x64xf32> to vector<16xf32>
    %92 = vector.shape_cast %91 : vector<16xf32> to vector<16x1xf32>
    %cst_47 = arith.constant 6.400000e+01 : f32
    %93 = vector.broadcast %cst_47 : f32 to vector<16x1xf32>
    %94 = arith.divf %92, %93 : vector<16x1xf32>
    %95 = vector.broadcast %87 : vector<16x1xf32> to vector<16x64xf32>
    %96 = arith.subf %79, %95 : vector<16x64xf32>
    %cst_48 = arith.constant 9.99999974E-6 : f32
    %97 = vector.broadcast %cst_48 : f32 to vector<16x1xf32>
    %98 = arith.addf %94, %97 : vector<16x1xf32>
    %99 = math.rsqrt %98 : vector<16x1xf32>
    %100 = vector.broadcast %99 : vector<16x1xf32> to vector<16x64xf32>
    %101 = arith.mulf %96, %100 : vector<16x64xf32>
    %102 = vector.broadcast %81 : vector<1x64xf32> to vector<16x64xf32>
    %103 = arith.mulf %101, %102 : vector<16x64xf32>
    %104 = vector.broadcast %83 : vector<1x64xf32> to vector<16x64xf32>
    %105 = arith.addf %103, %104 : vector<16x64xf32>
    %c0_49 = arith.constant 0 : index
    %c0_50 = arith.constant 0 : index
    %c0_51 = arith.constant 0 : index
    %106 = vector.load %arg7[%c0_49, %c0_50, %c0_51] : memref<1x64x128xf32, #tpu.memory_space<vmem>>, vector<1x64x128xf32>
    %107 = vector.shape_cast %106 : vector<1x64x128xf32> to vector<64x128xf32>
    %cst_52 = arith.constant dense<0.000000e+00> : vector<16x128xf32>
    %108 = tpu.matmul %105, %107, %cst_52 {dimension_numbers = #tpu.dot_dimension_numbers<[1], [0], [0], [1], [0, 0, 1, 1], [], []>} : vector<16x64xf32>, vector<64x128xf32>, vector<16x128xf32> -> vector<16x128xf32>
    %c0_53 = arith.constant 0 : index
    %c0_54 = arith.constant 0 : index
    %c0_55 = arith.constant 0 : index
    %109 = vector.load %arg8[%c0_53, %c0_54, %c0_55] : memref<1x1x128xf32, #tpu.memory_space<vmem>>, vector<1x1x128xf32>
    %110 = vector.shape_cast %109 : vector<1x1x128xf32> to vector<1x128xf32>
    %111 = vector.broadcast %110 : vector<1x128xf32> to vector<16x128xf32>
    %112 = arith.addf %108, %111 : vector<16x128xf32>
    %cst_56 = arith.constant 0.000000e+00 : f32
    %113 = vector.broadcast %cst_56 : f32 to vector<16x128xf32>
    %114 = arith.maximumf %112, %113 : vector<16x128xf32>
    %c0_57 = arith.constant 0 : index
    %c0_58 = arith.constant 0 : index
    %c0_59 = arith.constant 0 : index
    %115 = vector.load %arg9[%c0_57, %c0_58, %c0_59] : memref<1x128x64xf32, #tpu.memory_space<vmem>>, vector<1x128x64xf32>
    %116 = vector.shape_cast %115 : vector<1x128x64xf32> to vector<128x64xf32>
    %cst_60 = arith.constant dense<0.000000e+00> : vector<16x64xf32>
    %117 = tpu.matmul %114, %116, %cst_60 {dimension_numbers = #tpu.dot_dimension_numbers<[1], [0], [0], [1], [0, 0, 1, 1], [], []>} : vector<16x128xf32>, vector<128x64xf32>, vector<16x64xf32> -> vector<16x64xf32>
    %c0_61 = arith.constant 0 : index
    %c0_62 = arith.constant 0 : index
    %c0_63 = arith.constant 0 : index
    %118 = vector.load %arg10[%c0_61, %c0_62, %c0_63] : memref<1x1x64xf32, #tpu.memory_space<vmem>>, vector<1x1x64xf32>
    %119 = vector.shape_cast %118 : vector<1x1x64xf32> to vector<1x64xf32>
    %120 = vector.broadcast %119 : vector<1x64xf32> to vector<16x64xf32>
    %121 = arith.addf %117, %120 : vector<16x64xf32>
    %122 = arith.addf %121, %105 : vector<16x64xf32>
    %c0_64 = arith.constant 0 : index
    %c0_65 = arith.constant 0 : index
    %c0_66 = arith.constant 0 : index
    %123 = vector.load %arg13[%c0_64, %c0_65, %c0_66] : memref<1x1x64xf32, #tpu.memory_space<vmem>>, vector<1x1x64xf32>
    %124 = vector.shape_cast %123 : vector<1x1x64xf32> to vector<1x64xf32>
    %c0_67 = arith.constant 0 : index
    %c0_68 = arith.constant 0 : index
    %c0_69 = arith.constant 0 : index
    %125 = vector.load %arg14[%c0_67, %c0_68, %c0_69] : memref<1x1x64xf32, #tpu.memory_space<vmem>>, vector<1x1x64xf32>
    %126 = vector.shape_cast %125 : vector<1x1x64xf32> to vector<1x64xf32>
    %cst_70 = arith.constant dense<0.000000e+00> : vector<16xf32>
    %127 = vector.multi_reduction <add>, %122, %cst_70 [1] : vector<16x64xf32> to vector<16xf32>
    %128 = vector.shape_cast %127 : vector<16xf32> to vector<16x1xf32>
    %cst_71 = arith.constant 6.400000e+01 : f32
    %129 = vector.broadcast %cst_71 : f32 to vector<16x1xf32>
    %130 = arith.divf %128, %129 : vector<16x1xf32>
    %131 = vector.broadcast %130 : vector<16x1xf32> to vector<16x64xf32>
    %132 = arith.subf %122, %131 : vector<16x64xf32>
    %133 = arith.mulf %132, %132 : vector<16x64xf32>
    %cst_72 = arith.constant dense<0.000000e+00> : vector<16xf32>
    %134 = vector.multi_reduction <add>, %133, %cst_72 [1] : vector<16x64xf32> to vector<16xf32>
    %135 = vector.shape_cast %134 : vector<16xf32> to vector<16x1xf32>
    %cst_73 = arith.constant 6.400000e+01 : f32
    %136 = vector.broadcast %cst_73 : f32 to vector<16x1xf32>
    %137 = arith.divf %135, %136 : vector<16x1xf32>
    %138 = vector.broadcast %130 : vector<16x1xf32> to vector<16x64xf32>
    %139 = arith.subf %122, %138 : vector<16x64xf32>
    %cst_74 = arith.constant 9.99999974E-6 : f32
    %140 = vector.broadcast %cst_74 : f32 to vector<16x1xf32>
    %141 = arith.addf %137, %140 : vector<16x1xf32>
    %142 = math.rsqrt %141 : vector<16x1xf32>
    %143 = vector.broadcast %142 : vector<16x1xf32> to vector<16x64xf32>
    %144 = arith.mulf %139, %143 : vector<16x64xf32>
    %145 = vector.broadcast %124 : vector<1x64xf32> to vector<16x64xf32>
    %146 = arith.mulf %144, %145 : vector<16x64xf32>
    %147 = vector.broadcast %126 : vector<1x64xf32> to vector<16x64xf32>
    %148 = arith.addf %146, %147 : vector<16x64xf32>
    %c0_75 = arith.constant 0 : index
    %c0_76 = arith.constant 0 : index
    %149 = vector.load %arg16[%c0_75, %c0_76] : memref<16x64xf32, #tpu.memory_space<vmem>>, vector<16x64xf32>
    tpu.vector_store %arg16[%c0_75, %c0_76], %148 {strides = array<i32>} : memref<16x64xf32, #tpu.memory_space<vmem>>, vector<16x64xf32>,
    %c1_i32 = arith.constant 1 : i32
    %150 = arith.cmpi eq, %arg1, %c1_i32 : i32
    %151 = arith.extui %150 : i1 to i32
    %c0_i32_77 = arith.constant 0 : i32
    %152 = arith.cmpi ne, %151, %c0_i32_77 : i32
    scf.if %152 {
      %c0_78 = arith.constant 0 : index
      %c0_79 = arith.constant 0 : index
      %c0_80 = arith.constant 0 : index
      %153 = vector.load %arg15[%c0_78, %c0_79, %c0_80] : memref<1x16x64xf32, #tpu.memory_space<vmem>>, vector<1x16x64xf32>
      %154 = vector.shape_cast %153 : vector<1x16x64xf32> to vector<16x64xf32>
      %155 = vector.shape_cast %148 : vector<16x64xf32> to vector<1x16x64xf32>
      tpu.vector_store %arg15[%c0_78, %c0_79, %c0_80], %155 {strides = array<i32>} : memref<1x16x64xf32, #tpu.memory_space<vmem>>, vector<1x16x64xf32>,
    } else {
    }
    return
  }
  func.func @transform_0(%arg0: i32, %arg1: i32) -> (i32, i32, i32) {
    %c0_i32 = arith.constant 0 : i32
    %c0_i32_0 = arith.constant 0 : i32
    %c0_i32_1 = arith.constant 0 : i32
    return %arg0, %c0_i32, %c0_i32_0 : i32, i32, i32
  }
  func.func @transform_1(%arg0: i32, %arg1: i32) -> (i32, i32, i32) {
    %c0_i32 = arith.constant 0 : i32
    %c0_i32_0 = arith.constant 0 : i32
    %c0_i32_1 = arith.constant 0 : i32
    return %arg1, %c0_i32, %c0_i32_0 : i32, i32, i32
  }
  func.func @transform_2(%arg0: i32, %arg1: i32) -> (i32, i32, i32) {
    %c0_i32 = arith.constant 0 : i32
    %c0_i32_0 = arith.constant 0 : i32
    %c0_i32_1 = arith.constant 0 : i32
    return %arg1, %c0_i32, %c0_i32_0 : i32, i32, i32
  }
  func.func @transform_3(%arg0: i32, %arg1: i32) -> (i32, i32, i32) {
    %c0_i32 = arith.constant 0 : i32
    %c0_i32_0 = arith.constant 0 : i32
    %c0_i32_1 = arith.constant 0 : i32
    return %arg1, %c0_i32, %c0_i32_0 : i32, i32, i32
  }
  func.func @transform_4(%arg0: i32, %arg1: i32) -> (i32, i32, i32) {
    %c0_i32 = arith.constant 0 : i32
    %c0_i32_0 = arith.constant 0 : i32
    %c0_i32_1 = arith.constant 0 : i32
    return %arg1, %c0_i32, %c0_i32_0 : i32, i32, i32
  }
  func.func @transform_5(%arg0: i32, %arg1: i32) -> (i32, i32, i32) {
    %c0_i32 = arith.constant 0 : i32
    %c0_i32_0 = arith.constant 0 : i32
    %c0_i32_1 = arith.constant 0 : i32
    return %arg1, %c0_i32, %c0_i32_0 : i32, i32, i32
  }
  func.func @transform_6(%arg0: i32, %arg1: i32) -> (i32, i32, i32) {
    %c0_i32 = arith.constant 0 : i32
    %c0_i32_0 = arith.constant 0 : i32
    %c0_i32_1 = arith.constant 0 : i32
    return %arg1, %c0_i32, %c0_i32_0 : i32, i32, i32
  }
  func.func @transform_7(%arg0: i32, %arg1: i32) -> (i32, i32, i32) {
    %c0_i32 = arith.constant 0 : i32
    %c0_i32_0 = arith.constant 0 : i32
    %c0_i32_1 = arith.constant 0 : i32
    return %arg1, %c0_i32, %c0_i32_0 : i32, i32, i32
  }
  func.func @transform_8(%arg0: i32, %arg1: i32) -> (i32, i32, i32) {
    %c0_i32 = arith.constant 0 : i32
    %c0_i32_0 = arith.constant 0 : i32
    %c0_i32_1 = arith.constant 0 : i32
    return %arg1, %c0_i32, %c0_i32_0 : i32, i32, i32
  }
  func.func @transform_9(%arg0: i32, %arg1: i32) -> (i32, i32, i32) {
    %c0_i32 = arith.constant 0 : i32
    %c0_i32_0 = arith.constant 0 : i32
    %c0_i32_1 = arith.constant 0 : i32
    return %arg1, %c0_i32, %c0_i32_0 : i32, i32, i32
  }
  func.func @transform_10(%arg0: i32, %arg1: i32) -> (i32, i32, i32) {
    %c0_i32 = arith.constant 0 : i32
    %c0_i32_0 = arith.constant 0 : i32
    %c0_i32_1 = arith.constant 0 : i32
    return %arg1, %c0_i32, %c0_i32_0 : i32, i32, i32
  }
  func.func @transform_11(%arg0: i32, %arg1: i32) -> (i32, i32, i32) {
    %c0_i32 = arith.constant 0 : i32
    %c0_i32_0 = arith.constant 0 : i32
    %c0_i32_1 = arith.constant 0 : i32
    return %arg1, %c0_i32, %c0_i32_0 : i32, i32, i32
  }
  func.func @transform_12(%arg0: i32, %arg1: i32) -> (i32, i32, i32) {
    %c0_i32 = arith.constant 0 : i32
    %c0_i32_0 = arith.constant 0 : i32
    %c0_i32_1 = arith.constant 0 : i32
    return %arg1, %c0_i32, %c0_i32_0 : i32, i32, i32
  }
  func.func @transform_13(%arg0: i32, %arg1: i32) -> (i32, i32, i32) {
    %c0_i32 = arith.constant 0 : i32
    %c0_i32_0 = arith.constant 0 : i32
    %c0_i32_1 = arith.constant 0 : i32
    return %arg0, %c0_i32, %c0_i32_0 : i32, i32, i32
  }
}

</mosaic_0001>

<bundles_post_ra>
// kernel: tpu_custom_call.1
= control target key start
LH: loop header
LB: loop body
LE: loop exit
PB: predicated region body
PF: predicated region fallthrough
CT: control target
= control target key end

     0   :  { %s3721_s0 = inlined_call_operand.hbm [shape: f32[2,16,64], index: 0, kind: input, shape index: {}]   ;;  %s3722_s1 = inlined_call_operand.vmem [shape: f32[2,64,192], index: 1, kind: input, shape index: {}]   ;;  %s3723_s2 = inlined_call_operand.vmem [shape: f32[2,1,192], index: 2, kind: input, shape index: {}]   ;;  %s3724_s3 = inlined_call_operand.vmem [shape: f32[2,64,64], index: 3, kind: input, shape index: {}]   ;;  %s3725_s4 = inlined_call_operand.vmem [shape: f32[2,1,64], index: 4, kind: input, shape index: {}]   ;;  %s3726_s5 = inlined_call_operand.hbm [shape: f32[2,64,128], index: 5, kind: input, shape index: {}]   ;;  %s3727_s6 = inlined_call_operand.vmem [shape: f32[2,1,128], index: 6, kind: input, shape index: {}]   ;;  %s3728_s7 = inlined_call_operand.vmem [shape: f32[2,128,64], index: 7, kind: input, shape index: {}]   ;;  %s3729_s8 = inlined_call_operand.vmem [shape: f32[2,1,64], index: 8, kind: input, shape index: {}]   ;;  %s3730_s9 = inlined_call_operand.vmem [shape: f32[2,1,64], index: 9, kind: input, shape index: {}]   ;;  %s3731_s10 = inlined_call_operand.vmem [shape: f32[2,1,64], index: 10, kind: input, shape index: {}]   ;;  %s3732_s11 = inlined_call_operand.vmem [shape: f32[2,1,64], index: 11, kind: input, shape index: {}]   ;;  %s3733_s12 = inlined_call_operand.vmem [shape: f32[2,1,64], index: 12, kind: input, shape index: {}]   ;;  %s3734_s13 = inlined_call_operand.hbm [shape: f32[2,16,64], index: 13, kind: output, shape index: {}]  }
   0x1   :  { %3759 = sst [smem:[#allocation29_spill]] %s3721_s0 }
   0x2   :  { %3760 = sst [smem:[#allocation30_spill]] %s3722_s1 }
   0x3   :  { %3761 = sst [smem:[#allocation31_spill]] %s3723_s2 }
   0x4   :  { %3762 = sst [smem:[#allocation32_spill]] %s3724_s3 }
   0x5   :  { %3763 = sst [smem:[#allocation33_spill]] %s3726_s5 }
   0x6   :  { %3764 = sst [smem:[#allocation34_spill]] %s3727_s6 }
   0x7   :  { %3765 = sst [smem:[#allocation35_spill]] %s3728_s7 }
   0x8   :  { %3766 = sst [smem:[#allocation36_spill]] %s3729_s8 }
   0x9   :  { %3767 = sst [smem:[#allocation37_spill]] %s3730_s9 }
   0xa   :  { %3768 = sst [smem:[#allocation38_spill]] %s3731_s10 }
   0xb   :  { %3769 = sst [smem:[#allocation39_spill]] %s3732_s11 }
   0xc   :  { %3770 = sst [smem:[#allocation40_spill]] %s3733_s12 }
   0xd   :  { %3771 = sst [smem:[#allocation41_spill]] %s3734_s13 }
   0xe   :  { %18 = vsyncpa [#allocation5], 0 }
   0xf   :  { %20 = vsyncpa [#allocation5 + $0x1], 0 }
  0x10   :  { %21 = vsyncpa [#allocation8], 0 }
  0x11   :  { %23 = vsyncpa [#allocation8 + $0x1], 0 }
  0x12   :  { %24 = vsyncpa [#allocation6], 0 }
  0x13   :  { %26 = vsyncpa [#allocation6 + $0x1], 0  ;;  %s3123_s25 = smov 0   ;;  %s3125_s26 = smov 0  }
  0x14   :  { %s3127_s27 = smov 0   ;;  %s3129_s28 = smov 0  }
  0x15   :  { %s3131_s29 = smov 0   ;;  %s3133_s30 = smov 0  }
  0x16   :  { %s3135_s14 = smov 0   ;;  %s3137_s15 = smov 0  }
  0x17   :  { %s3139_s16 = smov 0   ;;  %s3141_s17 = smov 0  }
  0x18   :  { %s3143_s18 = smov 0  }
  0x19 LB: > { %3772 = sst [smem:[#allocation13_spill]] %s3000_s26  ;;  %s2266_s19 = sadd.s32 4294967295, %s3036_s18   ;;  %s3036_s18 = sphi %s3143_s18, %s32_s18   ;;  %s3032_s17 = sphi %s3141_s17, %s3846_s17   ;;  %s3028_s16 = sphi %s3139_s16, %s3845_s16   ;;  %s3024_s15 = sphi %s3137_s15, %s3844_s15   ;;  %s3020_s14 = sphi %s3135_s14, %s3843_s14   ;;  %s3016_s30 = sphi %s3133_s30, %s3842_s30   ;;  %s3012_s29 = sphi %s3131_s29, %s3841_s29   ;;  %s3008_s28 = sphi %s3129_s28, %s3840_s28   ;;  %s3004_s27 = sphi %s3127_s27, %s3839_s27   ;;  %s3000_s26 = sphi %s3125_s26, %s3838_s26   ;;  %s2996_s25 = sphi %s3123_s25, %s3837_s25  }
  0x1a   : > { %3773 = sst [smem:[#allocation14_spill]] %s3004_s27  ;;  %s2267_s20 = sadd.s32 4294967294, %s3036_s18  }
  0x1b   : > { %3774 = sst [smem:[#allocation15_spill]] %s3008_s28  ;;  %p58_p0 = scmp.ne.s32.totalorder %s3016_s30, %s3012_s29 }
  0x1c   : > { %3775 = sst [smem:[#allocation16_spill]] %s3012_s29  ;;  %p3741_p1 = scmp.eq.s32.totalorder %s3036_s18, 0 }
  0x1d   : > { %3776 = sst [smem:[#allocation17_spill]] %s3016_s30  ;;  %p64_p2 = scmp.ne.s32.totalorder %s3012_s29, %s3008_s28 }
  0x1e   : > { %3777 = sst [smem:[#allocation18_spill]] %s3024_s15  ;;  %p3187_p3 = scmp.eq.s32.totalorder %s2266_s19, 0 }
  0x1f   : > { %3778 = sst [smem:[#allocation19_spill]] %s3028_s16  ;;  %p3193_p4 = por %p3741_p1, %p58_p0 }
  0x20   : > { %3779 = sst [smem:[#allocation20_spill]] %s3032_s17  ;;  %p400_p5 = scmp.eq.s32.totalorder %s2266_s19, 3 }
  0x21   : > { %3780 = sst [smem:[#allocation21_spill]] %s3036_s18  ;;  %p3199_p6 = por %p3187_p3, %p64_p2 }
  0x22   : > { %p406_p7 = scmp.eq.s32.totalorder %s2267_s20, 3  ;;  %p3203_p8 = por %p400_p5, %p58_p0 }
  0x23   : > { %s3783_s21 = scalar_select %p3199_p6, 1, 0 }
  0x24   : > { %s3784_s22 = scalar_select %p3203_p8, 1, 0 }
  0x25   : > { %p3207_p9 = por %p406_p7, %p64_p2  ;;  %p3740_p10 = scmp.lt.s32.totalorder %s3036_s18, 4 }
  0x26   : > { %3785 = sst [smem:[#allocation22_spill]] %s3784_s22  ;;  %s426_s13 = sand.u32 1, %s3016_s30  }
  0x27   : > { %s3786_s28 = scalar_select %p3207_p9, 1, 0 }
  0x28   : > { %s2331_s15 = sshll.u32 %s3032_s17, 8  ;;  %s2270_s12 = sshll.u32 %s426_s13, 4 }
  0x29   : > { %3787 = sst [smem:[#allocation23_spill]] %s3786_s28  ;;  %s3788_s0 = sld [smem:[#allocation29_spill]] }
  0x2a   : > { %s430_s20 = scalar_lea.vmem [#allocation4], %s2270_s12  ;;  %p3223_p11 = pnand %p3740_p10, %p3193_p4 }
  0x2b   : > { %s437_s9 = sshll.u32 %s430_s20, 4  ;;  %s3229_s28 = scalar_lea.sflag [#allocation5], %s426_s13  ;;  %s3227_s9 = int_to_ptr.vmem [resolvable:$true] %s437_s9 }
  0x2c   : > { %p2852_p13 = pneg %p3223_p11 }
  0x2f   : > { %s3217_s10 = scalar_lea.hbm %s3788_s0, %s2331_s15  ;;  %s2855_s24 = scalar_lea.hbm %s3788_s0, 512 }
  0x30   : > { %s2850_s11 = scalar_lea.hbm %s3217_s10, 256  ;;  %p2856_p4 = scmp.lt.u32.totalorder %s3217_s10, %s3788_s0 }
  0x31   : > { %p2851_p12 = scmp.ne.s32.totalorder %s3217_s10, %s2850_s11  ;;  %p2857_p5 = scmp.lt.u32.totalorder %s2855_s24, %s2850_s11 }
  0x32   : > { %p2859_p10 = scmp.lt.u32.totalorder %s2850_s11, %s3217_s10 }
  0x33   : > { %p2853_p0 = pnand %p2852_p13, %p2851_p12  ;;  %p2858_p7 = por %p2857_p5, %p2856_p4 }
  0x35   : > { %p2854_p2 = pneg %p2853_p0  ;;  %p2860_p1 = por %p2859_p10, %p2858_p7 }
  0x37   : > { %p2861_p9 = pnand %p2860_p1, %p2854_p2 }
  0x39   : > { %2864 = shalt.err (!%p2861_p9)
}
  0x3a   : > { %s2865_s13 = scalar_lea.vmem %s3227_s9, 256  ;;  %s3038_s12 = smov [#allocation4]  }
  0x3b   : > { %p2866_p12 = scmp.ne.s32.totalorder %s3227_s9, %s2865_s13  ;;  %s2870_s15 = sshll.u32 %s3038_s12, 4  ;;  %s2871_s15 = int_to_ptr.vmem [resolvable:$false] %s2870_s15 }
  0x3c   : > { %s2872_s19 = scalar_lea.vmem %s2871_s15, 512  ;;  %p2873_p6 = scmp.lt.s32.totalorder %s3227_s9, %s2871_s15 }
  0x3d   : > { %p2868_p0 = pnand %p2866_p12, %p2852_p13  ;;  %p2874_p4 = scmp.lt.s32.totalorder %s2872_s19, %s2865_s13 }
  0x3f   : > { %p2869_p8 = pneg %p2868_p0  ;;  %p2875_p5 = por %p2874_p4, %p2873_p6 }
  0x41   : > { %p2876_p10 = pnand %p2875_p5, %p2869_p8 }
  0x43   : > { %2879 = shalt.err (!%p2876_p10)
}
  0x44   : > { %s3744_s11 = smov 128   ;;  %s3745_s24 = smov 8  }
  0x45   : > { %2665 = dma.hbm_to_vmem [thread:$0]  (!%p3223_p11), %s3217_s10, 256, %s3227_s9, %s3229_s28, %s3744_s11, %s3744_s11, %s3745_s24  }
  0x46   : > { %p2276_p1 = scmp.ge.s32.totalorder %s3036_s18, 1  ;;  %p539_p6 = scmp.lt.s32.totalorder %s3036_s18, 5 }
  0x47   : > { %s41_s13 = sadd.s32 1, %s3028_s16  ;;  %s181_s12 = sadd.s32 1, %s3004_s27 }
  0x48   : > { %p3262_p8 = pnand %p2276_p1, %p539_p6  ;;  %p42_p9 = scmp.ge.s32.totalorder %s41_s13, 2 }
  0x49   : > { %p188_p13 = scmp.ne.s32.totalorder %s3004_s27, %s3000_s26  ;;  %p194_p2 = scmp.ne.s32.totalorder %s3000_s26, %s2996_s25 }
  0x4a   : > { %s3848_s13 = smov (%p42_p9, %s41_s13), 0  ;;  %s3792_s9 = sadd.s32 1, %s3032_s17 }
  0x4b   : > { %3791 = sst [smem:[#allocation24_spill]] %s3848_s13  ;;  %s3850_s9 = smov (!%p42_p9, %s3792_s9), %s3032_s17 }
  0x4c   : > { %s178_s10 = ssub.s32 %s3028_s16, %s3848_s13  ;;  %p3793_p11 = scmp.eq.s32.totalorder %s3036_s18, 0 }
  0x4d   : > { %p46_p12 = scmp.ge.s32.totalorder %s3850_s9, 2  ;;  %p179_p0 = scmp.eq.s32.totalorder %s178_s10, 0 }
  0x4e   : > { %p3281_p7 = por %p188_p13, %p3793_p11  ;;  %p3287_p4 = por %p194_p2, %p3187_p3 }
  0x4f   : > { %s476_s25 = sand.u32 1, %s3004_s27   ;;  %s3852_s9 = smov (%p46_p12, %s3850_s9), 0 }
  0x50   : > { %s3795_s22 = scalar_select %p3287_p4, 1, 0 }
  0x51   : > { %3796 = sst [smem:[#allocation25_spill]] %s3852_s9  ;;  %s48_s19 = ssub.s32 %s3032_s17, %s3852_s9 }
  0x52   : > { %s3295_s15 = scalar_select %p179_p0, %s3004_s27, %s181_s12  }
  0x53   : > { %p49_p5 = scmp.eq.s32.totalorder %s48_s19, 0  ;;  %s2273_s11 = sshll.u32 %s476_s25, 6 }
  0x54   : > { %3797 = sst [smem:[#allocation26_spill]] %s3295_s15  ;;  %s2332_s24 = sshll.u32 %s3028_s16, 10 }
  0x55   : > { %s3798_s0 = sadd.s32 1, %s3016_s30  ;;  %s3800_s5 = sld [smem:[#allocation33_spill]] }
  0x56   : > { %s3303_s13 = scalar_select %p49_p5, %s3016_s30, %s3798_s0  }
  0x57   : > { %s480_s7 = scalar_lea.vmem [#allocation7], %s2273_s11  ;;  %p3801_p3 = scmp.lt.s32.totalorder %s3036_s18, 4 }
  0x58   : > { %3799 = sst [smem:[#allocation27_spill]] %s3303_s13  ;;  %s487_s6 = sshll.u32 %s480_s7, 4  ;;  %s3310_s6 = int_to_ptr.vmem [resolvable:$true] %s487_s6 }
  0x59   : > { %p3316_p10 = pnand %p3801_p3, %p3281_p7  ;;  %s3320_s0 = scalar_lea.sflag [#allocation8], %s476_s25 }
  0x5b   : > { %s3308_s23 = scalar_lea.hbm %s3800_s5, %s2332_s24  ;;  %p2882_p6 = pneg %p3316_p10 }
  0x5c   : > { %s2880_s8 = scalar_lea.hbm %s3308_s23, 1024  ;;  %s2885_s24 = scalar_lea.hbm %s3800_s5, 2048 }
  0x5d   : > { %p2881_p1 = scmp.ne.s32.totalorder %s3308_s23, %s2880_s8  ;;  %p2886_p2 = scmp.lt.u32.totalorder %s3308_s23, %s3800_s5 }
  0x5e   : > { %p2887_p11 = scmp.lt.u32.totalorder %s2885_s24, %s2880_s8  ;;  %p2889_p12 = scmp.lt.u32.totalorder %s2880_s8, %s3308_s23 }
  0x5f   : > { %p2883_p9 = pnand %p2882_p6, %p2881_p1 }
  0x60   : > { %p2888_p7 = por %p2887_p11, %p2886_p2 }
  0x61   : > { %p2884_p13 = pneg %p2883_p9 }
  0x62   : > { %p2890_p0 = por %p2889_p12, %p2888_p7 }
  0x64   : > { %p2891_p5 = pnand %p2890_p0, %p2884_p13 }
  0x66   : > { %2894 = shalt.err (!%p2891_p5)
}
  0x67   : > { %s2895_s25 = scalar_lea.vmem %s3310_s6, 1024  ;;  %s3041_s10 = smov [#allocation7]  }
  0x68   : > { %p2896_p3 = scmp.ne.s32.totalorder %s3310_s6, %s2895_s25  ;;  %s2900_s7 = sshll.u32 %s3041_s10, 4  ;;  %s2901_s7 = int_to_ptr.vmem [resolvable:$false] %s2900_s7 }
  0x69   : > { %s2902_s11 = scalar_lea.vmem %s2901_s7, 2048  ;;  %p2903_p4 = scmp.lt.s32.totalorder %s3310_s6, %s2901_s7 }
  0x6a   : > { %p2898_p1 = pnand %p2896_p3, %p2882_p6  ;;  %p2904_p2 = scmp.lt.s32.totalorder %s2902_s11, %s2895_s25 }
  0x6c   : > { %p2899_p9 = pneg %p2898_p1  ;;  %p2905_p11 = por %p2904_p2, %p2903_p4 }
  0x6e   : > { %p2906_p7 = pnand %p2905_p11, %p2899_p9 }
  0x70   : > { %2909 = shalt.err (!%p2906_p7)
}
  0x71   : > { %s3803_s8 = smov 8   ;;  %s3804_s24 = smov 128  }
  0x72   : > { %2668 = dma.hbm_to_vmem [thread:$0]  (!%p3316_p10), %s3308_s23, 1024, %s3310_s6, %s3320_s0, %s3804_s24, %s3804_s24, %s3803_s8  }
  0x73   : > { %543 = sbr.rel (%p3262_p8) target bundleno = 3781 (0xec5), region = 72 }
  0x7a   : > { %s3354_s28 = sand.u32 1, %s3012_s29   ;;  %p3806_p4 = scmp.ne.s32.totalorder %s3783_s21, 0 }
  0x7b   : > { %3805 = sst [smem:[#allocation28_spill]] %s3354_s28  ;;  %s2277_s19 = sshll.u32 %s3354_s28, 4 }
  0x7c   : > { %s546_s25 = scalar_lea.sflag [#allocation5], %s3354_s28  ;;  %s549_s10 = scalar_lea.vmem [#allocation4], %s2277_s19 }
  0x7d   : > { %2983 = dma.done.wait (%p3806_p4), %s546_s25, 256  }
  0x7e   : > { %2985 = vsyncadd (%p3806_p4), %s546_s25, 4294967040  ;;  %s554_s6 = sand.u32 1, %s3000_s26   ;;  %p3807_p8 = scmp.ne.s32.totalorder %s3795_s22, 0 }
  0x7f   : > { %s2278_s23 = sshll.u32 %s554_s6, 6  ;;  %s555_s20 = scalar_lea.sflag [#allocation8], %s554_s6 }
  0x80   : > { %s3363_s12 = scalar_lea.vmem [#allocation7], %s2278_s23 }
  0x81   : > { %2987 = dma.done.wait (%p3807_p8), %s555_s20, 1024  }
  0x82   : > { %2989 = vsyncadd (%p3807_p8), %s555_s20, 4294966272  ;;  %p646_p10 = scmp.lt.s32.totalorder %s3020_s14, 1  ;;  %s3808_s1 = sld [smem:[#allocation30_spill]] }
  0x83   : > { %s3809_s2 = sld [smem:[#allocation31_spill]]  ;;  %s3810_s3 = sld [smem:[#allocation32_spill]] }
  0x84   : > { %s3371_s0 = scalar_select %p646_p10, %s3020_s14, 1 }
  0x85   : > { %s3812_s27 = sld [smem:[#allocation35_spill]]  ;;  %s3814_s9 = sld [smem:[#allocation37_spill]] }
  0x86   : > { %s2333_s21 = sshll.u32 %s3371_s0, 7  ;;  %s2282_s7 = sshll.u32 %s3371_s0, 1 }
  0x87   : > { %s2334_s23 = sshll.u32 %s3371_s0, 6  ;;  %s3816_s30 = sld [smem:[#allocation39_spill]] }
  0x88   : > { %s3378_s8 = scalar_lea.vmem %s3808_s1, %s2333_s21  ;;  %p2287_p6 = scmp.ne.s32.totalorder %s3020_s14, 0 }
  0x89   : > { %s3383_s6 = scalar_lea.vmem %s3809_s2, %s2282_s7  ;;  %s3393_s13 = scalar_lea.vmem %s3810_s3, %s2334_s23  ;;  %v690_v0 = vld [vmem:[%s549_s10] sm:$0xff] (!%p2287_p6)  ;;  %vm692_vm0 = vcmask (!%p2287_p6), 523264   ;;  %v691_v1 = vld [vmem:[%s549_s10 + $0x8] sm:$0xff] (!%p2287_p6) }
  0x8a   : > { %s3813_s2 = sld [smem:[#allocation36_spill]]  ;;  %s3815_s23 = sld [smem:[#allocation38_spill]]  ;;  %693 = vst.msk [vmem:[#allocation2] sm:$0xff] (!%p2287_p6), %vm692_vm0, %v690_v0  ;;  %694 = vst.msk [vmem:[#allocation2 + $0x8] sm:$0xff] (!%p2287_p6), %vm692_vm0, %v691_v1 }
  0x8b   : > { %s3402_s24 = scalar_lea.vmem %s3812_s27, %s2333_s21  ;;  %s676_s18 = scalar_lea.vmem %s3814_s9, %s3371_s0 }
  0x8c   : > { %s3817_s27 = sld [smem:[#allocation40_spill]]  ;;  %s3424_s21 = scalar_lea.vmem [#allocation9], %s2277_s19 }
  0x8d   : > { %s682_s11 = scalar_lea.vmem %s3816_s30, %s3371_s0  ;;  %689 = sbr.rel (%p2287_p6) target bundleno = 148 (0x94), region = 84 }
  0x90   : > { %s673_s26 = scalar_lea.vmem %s3813_s2, %s3371_s0  ;;  %s679_s3 = scalar_lea.vmem %s3815_s23, %s3371_s0 }
  0x92   : > { %s685_s15 = scalar_lea.vmem %s3817_s27, %s3371_s0 }
  0x94 PF: > { %v698_v2 = vld [vmem:[%s3378_s8 + $0x8] sm:$0xff]  ;;  %v700_v3 = vld [vmem:[%s3378_s8 + $0x18] sm:$0xff]  ;;  %v697_v4 = vld [vmem:[%s3378_s8] sm:$0xff]  ;;  %v3042_v9 = vmov 0.0   ;;  %vm725_vm1 = vcmask 523264   ;;  %v715_v29 = vlaneseq  ;;  %vm815_vm2 = vcmask 130048   ;;  %s3820_s7 = scalar_lea.vmem %s3725_s4, %s3371_s0 }
  0x95   : > { %v2536_v5 = vpack.c.bf16 %v700_v3, %v698_v2  ;;  %v699_v6 = vld [vmem:[%s3378_s8 + $0x10] sm:$0xff]  ;;  %v702_v7 = vld [vmem:[%s3378_s8 + $0x28] sm:$0xff]  ;;  %v704_v8 = vld [vmem:[%s3378_s8 + $0x38] sm:$0xff]  ;;  %796 = vmatprep.mubr.f32.mxu0 %v3042_v9  ;;  %s3043_s2 = smov 64   ;;  %s3044_s9 = smov 48   ;;  %vm1214_vm4 = vcmask 261248  }
  0x96   : > { %v2538_v10 = vpack.c.bf16 %v699_v6, %v697_v4  ;;  %v2540_v11 = vpack.c.bf16 %v704_v8, %v702_v7  ;;  %v701_v12 = vld [vmem:[%s3378_s8 + $0x20] sm:$0xff]  ;;  %v703_v13 = vld [vmem:[%s3378_s8 + $0x30] sm:$0xff]  ;;  %v706_v14 = vld [vmem:[%s3378_s8 + $0x48] sm:$0xff]  ;;  %v716_v30 = vshrl.u32 %v715_v29, 7  ;;  %s3045_s28 = smov 112   ;;  %s3046_s19 = smov 32  }
  0x97   : > { %2537 = vmatprep.subr.bf16.mxu0 %v2536_v5  ;;  %v708_v15 = vld [vmem:[%s3378_s8 + $0x58] sm:$0xff]  ;;  %v2542_v16 = vpack.c.bf16 %v703_v13, %v701_v12  ;;  %v705_v18 = vld [vmem:[%s3378_s8 + $0x40] sm:$0xff]  ;;  %v707_v19 = vld [vmem:[%s3378_s8 + $0x50] sm:$0xff]  ;;  %s3047_s10 = smov 96   ;;  %vm1425_vm5 = vcmask 392448   ;;  %vm1636_vm6 = vcmask 523648  }
  0x98   : > { %2539 = vmatpush1.bf16.msra.mxu0 %v2538_v10  ;;  %v2544_v17 = vpack.c.bf16 %v708_v15, %v706_v14  ;;  %v710_v20 = vld [vmem:[%s3378_s8 + $0x68] sm:$0xff]  ;;  %v712_v21 = vld [vmem:[%s3378_s8 + $0x78] sm:$0xff]  ;;  %v2546_v22 = vpack.c.bf16 %v707_v19, %v705_v18  ;;  %v709_v24 = vld [vmem:[%s3378_s8 + $0x60] sm:$0xff]  ;;  %v717_v31 = vsub.s32 0, %v716_v30  ;;  %v721_v34 = vsub.s32 1, %v716_v30  ;;  %s3823_s29 = sld [smem:[#allocation34_spill]] }
  0x99   : > { %2541 = vmatprep.subr.bf16.mxu0 %v2540_v11  ;;  %v2548_v23 = vpack.c.bf16 %v712_v21, %v710_v20  ;;  %v711_v25 = vld [vmem:[%s3378_s8 + $0x70] sm:$0xff]  ;;  %v3443_v27 = vld [vmem:[#allocation2] sm:$0xff]  ;;  %v3447_v28 = vld [vmem:[#allocation2 + $0x8] sm:$0xff]  ;;  %s3048_s8 = smov 16   ;;  %p2325_p13 = scmp.ne.s32.totalorder %s3020_s14, 1 }
  0x9a   : > { %v2550_v26 = vpack.c.bf16 %v711_v25, %v709_v24  ;;  %v713_v32 = vld [vmem:[%s3383_s6] sm:$0x3]  ;;  %vm3467_vm3 = vmpackc.low %vm815_vm2, %vm815_vm2  ;;  %s3049_s6 = smov 80  }
  0x9b   : > { %v718_v33 = vrot.slane %v713_v32, %v717_v31  ;;  %v722_v38 = vrot.slane %v713_v32, %v721_v34 }
  0x9c   : > { %2543 = vmatpush1.bf16.msra.mxu0 %v2542_v16 }
  0x9d   : > { %2545 = vmatprep.subr.bf16.mxu0 %v2544_v17 }
  0x9e   : > { %s3824_s30 = scalar_lea.vmem %s3823_s29, %s3371_s0 }
  0xa0   : > { %2547 = vmatpush1.bf16.msra.mxu0 %v2546_v22 }
  0xa1   : > { %2549 = vmatprep.subr.bf16.mxu0 %v2548_v23 }
  0xa4   : > { %2551 = vmatpush1.bf16.msra.mxu0 %v2550_v26 }
  0xa7   : > { %2288 = vmatmul.mubr.msk.f32.vlgmr.msra.gmra.mrb[0].mxu0 %vm725_vm1, %v3443_v27 }
  0xa8   : > { %802 = vmatprep.mubr.f32.mxu0 %v3042_v9 }
  0xab   : > { %2289 = vmatmul.mubr.msk.f32.gmra.mrb[2].mxu0 %vm725_vm1, %v3447_v28 }
 0x17a   : > { %v798_v35 = vpop.f32.mrb[0].mxu0 }
 0x17b   : > { %v3452_v36 = vadd.f32 %v798_v35, %v718_v33  ;;  %v800_v37 = vpop.f32.mrb[1].mxu0 }
 0x17c   : > { %v801_v42 = vadd.f32 %v800_v37, %v722_v38 }
 0x17d   : > { %2411 = vmatprep.mubr.msk.f32.mxu1 %vm815_vm2, %v3452_v36 }
 0x17e   : > { %v804_v39 = vpop.f32.mrb[2].mxu0 }
 0x17f   : > { %v3456_v40 = vadd.f32 %v804_v39, %v718_v33  ;;  %v806_v41 = vpop.f32.mrb[3].mxu0 }
 0x180   : > { %v807_v43 = vadd.f32 %v806_v41, %v722_v38 }
 0x181   : > { %v3460_v44 = vpack.i.bf16 %v3456_v40, %v3452_v36 }
 0x182   : > { %v2558_v45 = vpack.c.bf16 %v807_v43, %v801_v42  ;;  %v3462_v46 = vpack.i.bf16 %v807_v43, %v801_v42 }
 0x183   : > { %2776 = vrot.lane.b32.xlu0 %v3460_v44, %s3043_s2 }
 0x1f5   : > { %v2777_v47 = vpop.permute.xlu0 %2776 }
 0x1f6   : > { %v2779_v48 = vunpack.i.h.bf16 %v2777_v47  ;;  %v2778_v49 = vunpack.i.l.bf16 %v2777_v47 }
 0x1f8   : > { %v2552_v51 = vpack.c.bf16 %v2779_v48, %v2778_v49 }
 0x1fa   : > { %2554 = vmatprep.subr.msk.bf16.mxu1 %vm3467_vm3, %v2552_v51 }
 0x1fb   : > { %2557 = vmatpush3.bf16.xpose.msk.msra.mxu1 %vm3467_vm3, %v2552_v51 }
 0x1fc   : > { %2559 = vmatprep.subr.bf16.mxu1 %v2558_v45 }
 0x202   : > { %2412 = vmatmul.mubr.msk.f32.vlgmr.msra.gmra.mrb[0].mxu1 %vm815_vm2, %v3456_v40 }
 0x203   : > { %2561 = vmatpush3.bf16.msra.mxu1 %v2558_v45 }
 0x2d5   : > { %v2413_v52 = vpop.f32.mrb[0].mxu1 }
 0x2d6   : > { %v890_v53 = vpop.f32.mrb[1].mxu1  ;;  %v902_v54 = vsel %vm815_vm2, %v2413_v52, -inf }
 0x2d7   : > { %903 = vmax.xlane.f32.xlu1 %v902_v54  ;;  %v899_v55 = vsel %vm815_vm2, %v890_v53, -inf }
 0x2d8   : > { %900 = vmax.xlane.f32.xlu0 %v899_v55 }
 0x2e8   : > { %2781 = vrot.lane.b32.xlu1 %v3460_v44, %s3044_s9 }
 0x2ec   : > { %1004 = vrot.lane.b32.xlu1 %v3452_v36, %s3045_s28 }
 0x2ee   : > { %1006 = vrot.lane.b32.xlu0 %v3456_v40, %s3045_s28 }
 0x364   : > { %v904_v56 = vpop.xlane.xlu1 %903 }
 0x365   : > { %v906_v57 = vsub.f32 %v2413_v52, %v904_v56  ;;  %v901_v58 = vpop.xlane.xlu0 %900 }
 0x366   : > { %v905_v59 = vsub.f32 %v890_v53, %v901_v58 }
 0x367   : > { %v909_v60 = vmul.f32 1.442695, %v906_v57 }
 0x368   : > { %v907_v61 = vmul.f32 1.442695, %v905_v59  ;;  %v2782_v62 = vpop.permute.xlu1 %2781 }
 0x369   : > { %2810 = vpow2.f32 %v909_v60  ;;  %v2784_v63 = vunpack.i.h.bf16 %v2782_v62  ;;  %v2783_v0 = vunpack.i.l.bf16 %v2782_v62  ;;  %v1007_v17 = vpop.permute.xlu0 %1006 }
 0x36a   : > { %2812 = vpow2.f32 %v907_v61 }
 0x36b   : > { %v2562_v1 = vpack.c.bf16 %v2784_v63, %v2783_v0 }
 0x36c   : > { %v1005_v6 = vpop.permute.xlu1 %1004 }
 0x36d   : > { %2564 = vmatprep.subr.msk.bf16.mxu1 %vm3467_vm3, %v2562_v1 }
 0x373   : > { %v2811_v2 = vpop.eup %2810 }
 0x374   : > { %v914_v3 = vsel %vm815_vm2, %v2811_v2, 0.0  ;;  %v2813_v4 = vpop.eup %2812 }
 0x375   : > { %915 = vadd.xlane.f32.xlu1 %v914_v3  ;;  %v911_v5 = vsel %vm815_vm2, %v2813_v4, 0.0 }
 0x379   : > { %912 = vadd.xlane.f32.xlu1 %v911_v5 }
 0x38a   : > { %2786 = vrot.lane.b32.xlu1 %v3460_v44, %s3046_s19 }
 0x38e   : > { %1217 = vrot.lane.b32.xlu1 %v3452_v36, %s3047_s10 }
 0x392   : > { %1219 = vrot.lane.b32.xlu1 %v3456_v40, %s3047_s10 }
 0x402   : > { %v916_v7 = vpop.xlane.xlu1 %915 }
 0x403   : > { %2814 = vrcp.f32 %v916_v7 }
 0x406   : > { %v913_v8 = vpop.xlane.xlu1 %912 }
 0x407   : > { %2816 = vrcp.f32 %v913_v8 }
 0x40a   : > { %v2787_v9 = vpop.permute.xlu1 %2786 }
 0x40b   : > { %v2789_v12 = vunpack.i.h.bf16 %v2787_v9  ;;  %v2788_v13 = vunpack.i.l.bf16 %v2787_v9 }
 0x40d   : > { %v2815_v10 = vpop.eup %2814  ;;  %v2572_v16 = vpack.c.bf16 %v2789_v12, %v2788_v13 }
 0x40e   : > { %v920_v15 = vmul.f32 %v2815_v10, %v2811_v2  ;;  %v1218_v18 = vpop.permute.xlu1 %1217 }
 0x411   : > { %v2817_v11 = vpop.eup %2816 }
 0x412   : > { %v918_v14 = vmul.f32 %v2817_v11, %v2813_v4  ;;  %v1220_v19 = vpop.permute.xlu1 %1219 }
 0x414   : > { %2418 = vmatprep.mubr.msk.f32.mxu1 %vm815_vm2, %v918_v14 }
 0x415   : > { %2419 = vmatmul.mubr.msk.f32.vlgmr.msra.gmra.mrb[2].mxu1 %vm815_vm2, %v920_v15 }
 0x416   : > { %2567 = vmatpush3.bf16.xpose.msk.msra.mxu1 %vm3467_vm3, %v2562_v1  ;;  %2425 = vmatprep.mubr.msk.f32.mxu1 %vm815_vm2, %v1005_v6 }
 0x417   : > { %2574 = vmatprep.subr.msk.bf16.mxu1 %vm3467_vm3, %v2572_v16 }
 0x41d   : > { %2426 = vmatmul.mubr.msk.f32.vlgmr.msra.gmra.mrb[4].mxu1 %vm815_vm2, %v1007_v17 }
 0x41e   : > { %2577 = vmatpush3.bf16.xpose.msk.msra.mxu1 %vm3467_vm3, %v2572_v16  ;;  %2439 = vmatprep.mubr.msk.f32.mxu1 %vm815_vm2, %v1218_v18 }
 0x425   : > { %2440 = vmatmul.mubr.msk.f32.vlgmr.msra.gmra.mrb[6].mxu1 %vm815_vm2, %v1220_v19 }
 0x4e8   : > { %v2420_v20 = vpop.f32.mrb[2].mxu1 }
 0x4e9   : > { %1003 = vst.msk [vmem:[#allocation3 + $0x8] sm:$0xff] %vm815_vm2, %v2420_v20  ;;  %v993_v21 = vpop.f32.mrb[3].mxu1 }
 0x4ea   : > { %1002 = vst.msk [vmem:[#allocation3] sm:$0xff] %vm815_vm2, %v993_v21 }
 0x4f0   : > { %v2427_v22 = vpop.f32.mrb[4].mxu1 }
 0x4f1   : > { %v1086_v23 = vpop.f32.mrb[5].mxu1  ;;  %v1098_v24 = vsel %vm815_vm2, %v2427_v22, -inf }
 0x4f2   : > { %1099 = vmax.xlane.f32.xlu0 %v1098_v24  ;;  %v1095_v25 = vsel %vm815_vm2, %v1086_v23, -inf }
 0x4f3   : > { %1096 = vmax.xlane.f32.xlu1 %v1095_v25 }
 0x4f8   : > { %v2441_v26 = vpop.f32.mrb[6].mxu1 }
 0x4f9   : > { %v1299_v29 = vpop.f32.mrb[7].mxu1  ;;  %v1311_v31 = vsel %vm815_vm2, %v2441_v26, -inf }
 0x4fa   : > { %v1308_v30 = vsel %vm815_vm2, %v1299_v29, -inf }
 0x4fb   : > { %1309 = vmax.xlane.f32.xlu1 %v1308_v30 }
 0x4ff   : > { %1312 = vmax.xlane.f32.xlu1 %v1311_v31 }
 0x57f   : > { %v1100_v32 = vpop.xlane.xlu0 %1099 }
 0x580   : > { %v1102_v33 = vsub.f32 %v2427_v22, %v1100_v32  ;;  %v1097_v34 = vpop.xlane.xlu1 %1096 }
 0x581   : > { %v1101_v35 = vsub.f32 %v1086_v23, %v1097_v34 }
 0x582   : > { %v1105_v37 = vmul.f32 1.442695, %v1102_v33 }
 0x583   : > { %v1103_v38 = vmul.f32 1.442695, %v1101_v35 }
 0x584   : > { %2818 = vpow2.f32 %v1105_v37 }
 0x585   : > { %2820 = vpow2.f32 %v1103_v38 }
 0x588   : > { %v1310_v39 = vpop.xlane.xlu1 %1309 }
 0x589   : > { %v1314_v41 = vsub.f32 %v1299_v29, %v1310_v39 }
 0x58b   : > { %v1316_v42 = vmul.f32 1.442695, %v1314_v41 }
 0x58c   : > { %v1313_v43 = vpop.xlane.xlu1 %1312 }
 0x58d   : > { %2822 = vpow2.f32 %v1316_v42  ;;  %v1315_v45 = vsub.f32 %v2441_v26, %v1313_v43 }
 0x58e   : > { %v2819_v47 = vpop.eup %2818 }
 0x58f   : > { %v2821_v48 = vpop.eup %2820  ;;  %v1318_v49 = vmul.f32 1.442695, %v1315_v45  ;;  %v1110_v51 = vsel %vm815_vm2, %v2819_v47, 0.0 }
 0x590   : > { %1111 = vadd.xlane.f32.xlu1 %v1110_v51  ;;  %v1107_v52 = vsel %vm815_vm2, %v2821_v48, 0.0 }
 0x591   : > { %2824 = vpow2.f32 %v1318_v49  ;;  %1108 = vadd.xlane.f32.xlu0 %v1107_v52 }
 0x597   : > { %v2823_v53 = vpop.eup %2822 }
 0x598   : > { %v1320_v54 = vsel %vm815_vm2, %v2823_v53, 0.0 }
 0x599   : > { %1321 = vadd.xlane.f32.xlu0 %v1320_v54  ;;  %v1642_v54 = vld [vmem:[%s3393_s13 + $0x8] sm:$0xff] }
 0x59b   : > { %v2825_v55 = vpop.eup %2824 }
 0x59c   : > { %v1323_v56 = vsel %vm815_vm2, %v2825_v55, 0.0 }
 0x59d   : > { %1324 = vadd.xlane.f32.xlu1 %v1323_v56 }
 0x5ae   : > { %2796 = vrot.lane.b32.xlu1 %v3462_v46, %s3047_s10 }
 0x5af   : > { %2791 = vrot.lane.b32.xlu0 %v3462_v46, %s3045_s28 }
 0x5b2   : > { %2801 = vrot.lane.b32.xlu1 %v3460_v44, %s3048_s8 }
 0x5b3   : > { %1428 = vrot.lane.b32.xlu0 %v3452_v36, %s3049_s6 }
 0x5b6   : > { %1430 = vrot.lane.b32.xlu1 %v3456_v40, %s3049_s6 }
 0x61d   : > { %v1112_v58 = vpop.xlane.xlu1 %1111 }
 0x61e   : > { %v1109_v57 = vpop.xlane.xlu0 %1108 }
 0x61f   : > { %2826 = vrcp.f32 %v1109_v57  ;;  %v1644_v57 = vld [vmem:[%s3393_s13 + $0x18] sm:$0xff] }
 0x620   : > { %2828 = vrcp.f32 %v1112_v58 }
 0x626   : > { %v1322_v59 = vpop.xlane.xlu0 %1321 }
 0x627   : > { %2830 = vrcp.f32 %v1322_v59  ;;  %v1645_v59 = vld [vmem:[%s3393_s13 + $0x20] sm:$0xff] }
 0x629   : > { %v2827_v60 = vpop.eup %2826 }
 0x62a   : > { %v2792_v61 = vpop.permute.xlu0 %2791  ;;  %v1325_v62 = vpop.xlane.xlu1 %1324  ;;  %v1114_v63 = vmul.f32 %v2827_v60, %v2821_v48  ;;  %v1646_v60 = vld [vmem:[%s3393_s13 + $0x28] sm:$0xff] }
 0x62b   : > { %v2794_v0 = vunpack.i.h.bf16 %v2792_v61  ;;  %v2793_v1 = vunpack.i.l.bf16 %v2792_v61  ;;  %2832 = vrcp.f32 %v1325_v62  ;;  %v2829_v36 = vpop.eup %2828  ;;  %v2600_v61 = vpack.c.bf16 %v1646_v60, %v1645_v59  ;;  %v1647_v62 = vld [vmem:[%s3393_s13 + $0x30] sm:$0xff] }
 0x62c   : > { %2432 = vmatprep.mubr.msk.f32.mxu0 %vm815_vm2, %v1114_v63  ;;  %v1116_v5 = vmul.f32 %v2829_v36, %v2819_v47  ;;  %v1648_v63 = vld [vmem:[%s3393_s13 + $0x38] sm:$0xff] }
 0x62d   : > { %v2568_v44 = vpack.c.bf16 %v2794_v0, %v2793_v1  ;;  %v2604_v0 = vpack.c.bf16 %v1648_v63, %v1647_v62 }
 0x62e   : > { %v2797_v2 = vpop.permute.xlu1 %2796  ;;  %v1429_v14 = vpop.permute.xlu0 %1428 }
 0x62f   : > { %v2799_v3 = vunpack.i.h.bf16 %v2797_v2  ;;  %v2798_v40 = vunpack.i.l.bf16 %v2797_v2  ;;  %2569 = vmatprep.subr.bf16.mxu0 %v2568_v44 }
 0x630   : > { %2571 = vmatpush3.bf16.msra.mxu0 %v2568_v44 }
 0x631   : > { %v2831_v4 = vpop.eup %2830  ;;  %v2578_v6 = vpack.c.bf16 %v2799_v3, %v2798_v40 }
 0x632   : > { %v2802_v7 = vpop.permute.xlu1 %2801  ;;  %v1327_v8 = vmul.f32 %v2831_v4, %v2823_v53  ;;  %v1641_v53 = vld [vmem:[%s3393_s13] sm:$0xff] }
 0x633   : > { %v2804_v9 = vunpack.i.h.bf16 %v2802_v7  ;;  %v2803_v10 = vunpack.i.l.bf16 %v2802_v7  ;;  %2433 = vmatmul.mubr.msk.f32.vlgmr.msra.gmra.mrb[4].mxu0 %vm815_vm2, %v1116_v5  ;;  %2579 = vmatprep.subr.bf16.mxu0 %v2578_v6  ;;  %v2592_v56 = vpack.c.bf16 %v1642_v54, %v1641_v53  ;;  %v2314_v4 = vld [vmem:[%s3820_s7] ss:$0 sm:$0xff]  ;;  %v1892_v53 = vld [vmem:[%s3402_s24 + $0x50] sm:$0xff]  ;;  %v1893_v54 = vld [vmem:[%s3402_s24 + $0x58] sm:$0xff] }
 0x634   : > { %2581 = vmatpush3.bf16.msra.mxu0 %v2578_v6  ;;  %2446 = vmatprep.mubr.msk.f32.mxu0 %vm815_vm2, %v1327_v8 }
 0x635   : > { %v2833_v11 = vpop.eup %2832  ;;  %v2582_v12 = vpack.c.bf16 %v2804_v9, %v2803_v10 }
 0x636   : > { %v1329_v13 = vmul.f32 %v2833_v11, %v2825_v55  ;;  %v1431_v15 = vpop.permute.xlu1 %1430  ;;  %v1643_v55 = vld [vmem:[%s3393_s13 + $0x10] sm:$0xff] }
 0x637   : > { %2584 = vmatprep.subr.msk.bf16.mxu0 %vm3467_vm3, %v2582_v12  ;;  %v2596_v58 = vpack.c.bf16 %v1644_v57, %v1643_v55  ;;  %v2644_v55 = vpack.c.bf16 %v1893_v54, %v1892_v53  ;;  %v1895_v57 = vld [vmem:[%s3402_s24 + $0x68] sm:$0xff] }
 0x638   : > { %2447 = vmatmul.mubr.msk.f32.vlgmr.msra.gmra.mrb[6].mxu0 %vm815_vm2, %v1329_v13 }
 0x639   : > { %2453 = vmatprep.mubr.msk.f32.mxu0 %vm815_vm2, %v1429_v14 }
 0x63d   : > { %2587 = vmatpush3.bf16.xpose.msk.msra.mxu0 %vm3467_vm3, %v2582_v12 }
 0x63e   : > { %2593 = vmatprep.subr.bf16.mxu0 %v2592_v56 }
 0x644   : > { %2454 = vmatmul.mubr.msk.f32.vlgmr.msra.gmra.mrb[8].mxu0 %vm815_vm2, %v1431_v15 }
 0x645   : > { %2595 = vmatpush3.bf16.msra.mxu0 %v2592_v56  ;;  %v1894_v56 = vld [vmem:[%s3402_s24 + $0x60] sm:$0xff] }
 0x646   : > { %2597 = vmatprep.subr.bf16.mxu0 %v2596_v58 }
 0x649   : > { %2599 = vmatpush3.bf16.msra.mxu0 %v2596_v58  ;;  %v2648_v58 = vpack.c.bf16 %v1895_v57, %v1894_v56 }
 0x64a   : > { %2601 = vmatprep.subr.bf16.mxu0 %v2600_v61 }
 0x64d   : > { %2603 = vmatpush3.bf16.msra.mxu0 %v2600_v61 }
 0x64e   : > { %2605 = vmatprep.subr.bf16.mxu0 %v2604_v0 }
 0x651   : > { %2607 = vmatpush3.bf16.msra.mxu0 %v2604_v0 }
 0x706   : > { %v2434_v16 = vpop.f32.mrb[4].mxu0 }
 0x707   : > { %v1197_v17 = vpop.f32.mrb[5].mxu0 }
 0x70b   : > { %v2448_v18 = vpop.f32.mrb[6].mxu0 }
 0x70c   : > { %v1408_v19 = vpop.f32.mrb[7].mxu0 }
 0x717   : > { %v2455_v20 = vpop.f32.mrb[8].mxu0 }
 0x718   : > { %v1510_v21 = vpop.f32.mrb[9].mxu0  ;;  %v1522_v22 = vsel %vm815_vm2, %v2455_v20, -inf }
 0x719   : > { %1523 = vmax.xlane.f32.xlu1 %v1522_v22  ;;  %v1519_v23 = vsel %vm815_vm2, %v1510_v21, -inf  ;;  %v1785_v22 = vld [vmem:[%s3363_s12 + $0x8] sm:$0xff] }
 0x71a   : > { %1520 = vmax.xlane.f32.xlu0 %v1519_v23 }
 0x72a   : > { %2806 = vrot.lane.b32.xlu1 %v3462_v46, %s3049_s6 }
 0x72e   : > { %1210 = vrot.lane.b32.xlu1 %v2434_v16, %s3048_s8 }
 0x732   : > { %1419 = vrot.lane.b32.xlu1 %v1408_v19, %s3046_s19 }
 0x7a6   : > { %v1524_v50 = vpop.xlane.xlu1 %1523 }
 0x7a7   : > { %v1526_v24 = vsub.f32 %v2455_v20, %v1524_v50  ;;  %v1521_v25 = vpop.xlane.xlu0 %1520  ;;  %v1786_v50 = vld [vmem:[%s3363_s12 + $0x10] sm:$0xff] }
 0x7a8   : > { %v1525_v26 = vsub.f32 %v1510_v21, %v1521_v25  ;;  %v1784_v21 = vld [vmem:[%s3363_s12] sm:$0xff] }
 0x7a9   : > { %v1529_v29 = vmul.f32 1.442695, %v1526_v24  ;;  %v2608_v23 = vpack.c.bf16 %v1785_v22, %v1784_v21  ;;  %v1787_v24 = vld [vmem:[%s3363_s12 + $0x18] sm:$0xff] }
 0x7aa   : > { %v1527_v30 = vmul.f32 1.442695, %v1525_v26  ;;  %v2807_v31 = vpop.permute.xlu1 %2806  ;;  %v2612_v25 = vpack.c.bf16 %v1787_v24, %v1786_v50  ;;  %v1788_v26 = vld [vmem:[%s3363_s12 + $0x20] sm:$0xff] }
 0x7ab   : > { %v2809_v32 = vunpack.i.h.bf16 %v2807_v31  ;;  %v2808_v33 = vunpack.i.l.bf16 %v2807_v31  ;;  %2609 = vmatprep.subr.bf16.mxu0 %v2608_v23  ;;  %v1790_v31 = vld [vmem:[%s3363_s12 + $0x30] sm:$0xff] }
 0x7ac   : > { %2834 = vpow2.f32 %v1527_v30 }
 0x7ad   : > { %v2588_v34 = vpack.c.bf16 %v2809_v32, %v2808_v33  ;;  %2836 = vpow2.f32 %v1529_v29  ;;  %v1789_v29 = vld [vmem:[%s3363_s12 + $0x28] sm:$0xff]  ;;  %v1791_v32 = vld [vmem:[%s3363_s12 + $0x38] sm:$0xff] }
 0x7ae   : > { %v1211_v35 = vpop.permute.xlu1 %1210  ;;  %v2616_v30 = vpack.c.bf16 %v1789_v29, %v1788_v26  ;;  %v2620_v33 = vpack.c.bf16 %v1791_v32, %v1790_v31 }
 0x7af   : > { %1216 = vst.msk [vmem:[#allocation3 + $0x8] sm:$0xff] %vm1214_vm4, %v1211_v35  ;;  %2589 = vmatprep.subr.bf16.mxu1 %v2588_v34  ;;  %v1883_v35 = vld [vmem:[%s3402_s24 + $0x8] sm:$0xff] }
 0x7b0   : > { %2591 = vmatpush3.bf16.msra.mxu1 %v2588_v34  ;;  %v1882_v34 = vld [vmem:[%s3402_s24] sm:$0xff] }
 0x7b2   : > { %v1420_v45 = vpop.permute.xlu1 %1419 }
 0x7b6   : > { %v2835_v46 = vpop.eup %2834 }
 0x7b7   : > { %v1531_v37 = vsel %vm815_vm2, %v2835_v46, 0.0  ;;  %v2837_v38 = vpop.eup %2836 }
 0x7b8   : > { %1532 = vadd.xlane.f32.xlu0 %v1531_v37  ;;  %v1534_v39 = vsel %vm815_vm2, %v2837_v38, 0.0  ;;  %v2624_v37 = vpack.c.bf16 %v1883_v35, %v1882_v34 }
 0x7ba   : > { %2625 = vmatprep.subr.bf16.mxu1 %v2624_v37 }
 0x7bc   : > { %1535 = vadd.xlane.f32.xlu0 %v1534_v39 }
 0x7d2   : > { %1208 = vrot.lane.b32.xlu0 %v1197_v17, %s3048_s8 }
 0x7d6   : > { %1421 = vrot.lane.b32.xlu0 %v2448_v18, %s3046_s19 }
 0x845   : > { %v1533_v41 = vpop.xlane.xlu0 %1532 }
 0x846   : > { %2838 = vrcp.f32 %v1533_v41  ;;  %v1886_v41 = vld [vmem:[%s3402_s24 + $0x20] sm:$0xff] }
 0x849   : > { %v1536_v42 = vpop.xlane.xlu0 %1535 }
 0x84a   : > { %2840 = vrcp.f32 %v1536_v42  ;;  %v1887_v42 = vld [vmem:[%s3402_s24 + $0x28] sm:$0xff] }
 0x84d   : > { %v1209_v43 = vpop.permute.xlu0 %1208 }
 0x84e   : > { %1215 = vst.msk [vmem:[#allocation3] sm:$0xff] %vm1214_vm4, %v1209_v43  ;;  %v2632_v43 = vpack.c.bf16 %v1887_v42, %v1886_v41 }
 0x84f   : > { %1426 = vst.msk [vmem:[#allocation3] sm:$0xff] %vm1425_vm5, %v1420_v45  ;;  %v1888_v45 = vld [vmem:[%s3402_s24 + $0x30] sm:$0xff] }
 0x850   : > { %v2839_v47 = vpop.eup %2838 }
 0x851   : > { %v1422_v48 = vpop.permute.xlu0 %1421  ;;  %v1538_v49 = vmul.f32 %v2839_v47, %v2835_v46  ;;  %v1884_v46 = vld [vmem:[%s3402_s24 + $0x10] sm:$0xff]  ;;  %v1889_v47 = vld [vmem:[%s3402_s24 + $0x38] sm:$0xff] }
 0x852   : > { %1427 = vst.msk [vmem:[#allocation3 + $0x8] sm:$0xff] %vm1425_vm5, %v1422_v48  ;;  %v2636_v48 = vpack.c.bf16 %v1889_v47, %v1888_v45  ;;  %v2323_v45 = vld [vmem:[%s682_s11] ss:$0 sm:$0xff] }
 0x853   : > { %2460 = vmatprep.mubr.msk.f32.mxu1 %vm815_vm2, %v1538_v49  ;;  %v1890_v49 = vld [vmem:[%s3402_s24 + $0x40] sm:$0xff] }
 0x854   : > { %v2841_v51 = vpop.eup %2840 }
 0x855   : > { %v1540_v52 = vmul.f32 %v2841_v51, %v2837_v38  ;;  %v1885_v38 = vld [vmem:[%s3402_s24 + $0x18] sm:$0xff]  ;;  %v1891_v51 = vld [vmem:[%s3402_s24 + $0x48] sm:$0xff] }
 0x856   : > { %v2628_v39 = vpack.c.bf16 %v1885_v38, %v1884_v46 }
 0x857   : > { %2461 = vmatmul.mubr.msk.f32.vlgmr.msra.gmra.mrb[8].mxu1 %vm815_vm2, %v1540_v52  ;;  %v2640_v52 = vpack.c.bf16 %v1891_v51, %v1890_v49  ;;  %v2324_v49 = vld [vmem:[%s685_s15] ss:$0 sm:$0xff] }
 0x858   : > { %2627 = vmatpush3.bf16.msra.mxu1 %v2624_v37 }
 0x859   : > { %2629 = vmatprep.subr.bf16.mxu1 %v2628_v39 }
 0x85c   : > { %2631 = vmatpush3.bf16.msra.mxu1 %v2628_v39 }
 0x85d   : > { %2633 = vmatprep.subr.bf16.mxu1 %v2632_v43 }
 0x860   : > { %2635 = vmatpush3.bf16.msra.mxu1 %v2632_v43 }
 0x861   : > { %2637 = vmatprep.subr.bf16.mxu1 %v2636_v48 }
 0x864   : > { %2639 = vmatpush3.bf16.msra.mxu1 %v2636_v48 }
 0x865   : > { %2641 = vmatprep.subr.bf16.mxu1 %v2640_v52 }
 0x868   : > { %2643 = vmatpush3.bf16.msra.mxu1 %v2640_v52 }
 0x869   : > { %2645 = vmatprep.subr.bf16.mxu1 %v2644_v55 }
 0x86c   : > { %2647 = vmatpush3.bf16.msra.mxu1 %v2644_v55 }
 0x86d   : > { %2649 = vmatprep.subr.bf16.mxu1 %v2648_v58 }
 0x870   : > { %2651 = vmatpush3.bf16.msra.mxu1 %v2648_v58 }
 0x92a   : > { %v2462_v1 = vpop.f32.mrb[8].mxu1 }
 0x92b   : > { %1632 = vrot.lane.b32.xlu0 %v2462_v1, %s3044_s9  ;;  %v1619_v44 = vpop.f32.mrb[9].mxu1 }
 0x92c   : > { %1630 = vrot.lane.b32.xlu1 %v1619_v44, %s3044_s9  ;;  %v2317_v44 = vld [vmem:[%s676_s18] ss:$0 sm:$0xff] }
 0x99d   : > { %v1633_v36 = vpop.permute.xlu0 %1632 }
 0x99e   : > { %1638 = vst.msk [vmem:[#allocation3 + $0x8] sm:$0xff] %vm1636_vm6, %v1633_v36  ;;  %v1631_v2 = vpop.permute.xlu1 %1630 }
 0x99f   : > { %1637 = vst.msk [vmem:[#allocation3] sm:$0xff] %vm1636_vm6, %v1631_v2 }
 0x9a5   : > { %v1640_v40 = vld [vmem:[#allocation3 + $0x8] sm:$0xff] }
 0x9a6   : > { %v1639_v3 = vld [vmem:[#allocation3] sm:$0xff] }
 0x9a7   : > { %2479 = vmatprep.mubr.msk.f32.mxu0 %vm725_vm1, %v1639_v3 }
 0x9a8   : > { %2480 = vmatmul.mubr.msk.f32.vlgmr.msra.gmra.mrb[10].mxu0 %vm725_vm1, %v1640_v40  ;;  %v2318_v40 = vld [vmem:[%s679_s3] ss:$0 sm:$0xff] }
 0x9a9   : > { %2611 = vmatpush3.bf16.msra.mxu0 %v2608_v23 }
 0x9aa   : > { %2613 = vmatprep.subr.bf16.mxu0 %v2612_v25 }
 0x9ad   : > { %2615 = vmatpush3.bf16.msra.mxu0 %v2612_v25 }
 0x9ae   : > { %2617 = vmatprep.subr.bf16.mxu0 %v2616_v30 }
 0x9b1   : > { %2619 = vmatpush3.bf16.msra.mxu0 %v2616_v30 }
 0x9b2   : > { %2621 = vmatprep.subr.bf16.mxu0 %v2620_v33 }
 0x9b5   : > { %2623 = vmatpush3.bf16.msra.mxu0 %v2620_v33 }
 0xa7b   : > { %v2481_v5 = vpop.f32.mrb[10].mxu0 }
 0xa7c   : > { %v1734_v6 = vadd.f32 %v2481_v5, %v2314_v4  ;;  %v1728_v7 = vpop.f32.mrb[11].mxu0 }
 0xa7d   : > { %v1729_v8 = vadd.f32 %v2314_v4, %v1728_v7 }
 0xa7e   : > { %v1738_v9 = vadd.f32 %v1734_v6, %v3447_v28 }
 0xa7f   : > { %v1737_v10 = vadd.f32 %v1729_v8, %v3443_v27  ;;  %v1896_v8 = vld [vmem:[%s3402_s24 + $0x70] sm:$0xff] }
 0xa80   : > { %v1744_v11 = vsel %vm725_vm1, %v1738_v9, 0.0 }
 0xa81   : > { %1745 = vadd.xlane.f32.xlu0 %v1744_v11  ;;  %v1741_v12 = vsel %vm725_vm1, %v1737_v10, 0.0  ;;  %v2319_v11 = vld [vmem:[%s3824_s30] ss:$0 sm:$0xff] }
 0xa82   : > { %1742 = vadd.xlane.f32.xlu1 %v1741_v12 }
 0xb0e   : > { %v1746_v13 = vpop.xlane.xlu0 %1745 }
 0xb0f   : > { %v1749_v14 = vmul.f32 0.015625, %v1746_v13  ;;  %v1743_v15 = vpop.xlane.xlu1 %1742 }
 0xb10   : > { %v1748_v16 = vmul.f32 0.015625, %v1743_v15 }
 0xb11   : > { %v3572_v17 = vsub.f32 %v1738_v9, %v1749_v14  ;;  %v1897_v9 = vld [vmem:[%s3402_s24 + $0x78] sm:$0xff] }
 0xb12   : > { %v3574_v18 = vsub.f32 %v1737_v10, %v1748_v16  ;;  %v2652_v10 = vpack.c.bf16 %v1897_v9, %v1896_v8 }
 0xb13   : > { %v1753_v27 = vmul.f32 %v3572_v17, %v3572_v17 }
 0xb14   : > { %v1752_v28 = vmul.f32 %v3574_v18, %v3574_v18  ;;  %2653 = vmatprep.subr.bf16.mxu1 %v2652_v10 }
 0xb15   : > { %v1757_v19 = vsel %vm725_vm1, %v1753_v27, 0.0  ;;  %2655 = vmatpush3.bf16.msra.mxu1 %v2652_v10 }
 0xb16   : > { %1758 = vadd.xlane.f32.xlu1 %v1757_v19  ;;  %v1754_v20 = vsel %vm725_vm1, %v1752_v28, 0.0 }
 0xb17   : > { %1755 = vadd.xlane.f32.xlu0 %v1754_v20 }
 0xba3   : > { %v1759_v59 = vpop.xlane.xlu1 %1758 }
 0xba4   : > { %v1761_v60 = vmul.f32 0.015625, %v1759_v59  ;;  %v1756_v61 = vpop.xlane.xlu0 %1755 }
 0xba5   : > { %v1760_v62 = vmul.f32 0.015625, %v1756_v61 }
 0xba6   : > { %v1763_v63 = vadd.f32 1e-05, %v1761_v60 }
 0xba7   : > { %v1762_v0 = vadd.f32 1e-05, %v1760_v62 }
 0xba8   : > { %2842 = vrsqrt.f32 %v1763_v63 }
 0xba9   : > { %2844 = vrsqrt.f32 %v1762_v0 }
 0xbb2   : > { %v2843_v1 = vpop.eup %2842 }
 0xbb3   : > { %v2845_v36 = vpop.eup %2844  ;;  %v1767_v2 = vmul.f32 %v2843_v1, %v3572_v17 }
 0xbb4   : > { %v1766_v3 = vmul.f32 %v2845_v36, %v3574_v18  ;;  %v2322_v18 = vld [vmem:[%s673_s26] ss:$0 sm:$0xff] }
 0xbb5   : > { %v1775_v4 = vmul.f32 %v2317_v44, %v1767_v2 }
 0xbb6   : > { %v1774_v5 = vmul.f32 %v2317_v44, %v1766_v3 }
 0xbb7   : > { %v1783_v7 = vadd.f32 %v2318_v40, %v1775_v4 }
 0xbb8   : > { %v1782_v6 = vadd.f32 %v2318_v40, %v1774_v5 }
 0xbba   : > { %2498 = vmatprep.mubr.msk.f32.mxu0 %vm725_vm1, %v1782_v6 }
 0xbbb   : > { %2499 = vmatmul.mubr.msk.f32.vlgmr.msra.gmra.mrb[12].mxu0 %vm725_vm1, %v1783_v7 }
 0xc8e   : > { %v2500_v12 = vpop.f32.mrb[12].mxu0 }
 0xc8f   : > { %v1877_v13 = vadd.f32 %v2500_v12, %v2319_v11  ;;  %v1871_v14 = vpop.f32.mrb[13].mxu0 }
 0xc90   : > { %v1872_v15 = vadd.f32 %v2319_v11, %v1871_v14 }
 0xc91   : > { %v1881_v17 = vmax.f32 %v1877_v13, 0.0 }
 0xc92   : > { %v1880_v16 = vmax.f32 %v1872_v15, 0.0 }
 0xc94   : > { %2533 = vmatprep.mubr.f32.mxu1 %v1880_v16 }
 0xc95   : > { %2534 = vmatmul.mubr.f32.vlgmr.msra.gmra.mrb[10].mxu1 %v1881_v17 }
 0xd68   : > { %v2535_v27 = vpop.f32.mrb[10].mxu1 }
 0xd69   : > { %v1977_v28 = vadd.f32 %v2535_v27, %v2322_v18  ;;  %v1971_v19 = vpop.f32.mrb[11].mxu1 }
 0xd6a   : > { %v1972_v20 = vadd.f32 %v2322_v18, %v1971_v19 }
 0xd6b   : > { %v1981_v21 = vadd.f32 %v1977_v28, %v1783_v7 }
 0xd6c   : > { %v1980_v22 = vadd.f32 %v1972_v20, %v1782_v6 }
 0xd6d   : > { %v1987_v23 = vsel %vm725_vm1, %v1981_v21, 0.0 }
 0xd6e   : > { %1988 = vadd.xlane.f32.xlu1 %v1987_v23  ;;  %v1984_v50 = vsel %vm725_vm1, %v1980_v22, 0.0 }
 0xd6f   : > { %1985 = vadd.xlane.f32.xlu0 %v1984_v50 }
 0xdfb   : > { %v1989_v24 = vpop.xlane.xlu1 %1988 }
 0xdfc   : > { %v1991_v25 = vmul.f32 0.015625, %v1989_v24  ;;  %v1986_v26 = vpop.xlane.xlu0 %1985 }
 0xdfd   : > { %v1990_v29 = vmul.f32 0.015625, %v1986_v26 }
 0xdfe   : > { %v1993_v30 = vsub.f32 %v1981_v21, %v1991_v25 }
 0xdff   : > { %v1992_v31 = vsub.f32 %v1980_v22, %v1990_v29 }
 0xe00   : > { %v1995_v32 = vmul.f32 %v1993_v30, %v1993_v30 }
 0xe01   : > { %v1994_v33 = vmul.f32 %v1992_v31, %v1992_v31 }
 0xe02   : > { %v1999_v34 = vsel %vm725_vm1, %v1995_v32, 0.0 }
 0xe03   : > { %2000 = vadd.xlane.f32.xlu1 %v1999_v34  ;;  %v1996_v35 = vsel %vm725_vm1, %v1994_v33, 0.0 }
 0xe04   : > { %1997 = vadd.xlane.f32.xlu0 %v1996_v35 }
 0xe90   : > { %v2001_v46 = vpop.xlane.xlu1 %2000 }
 0xe91   : > { %v2003_v37 = vmul.f32 0.015625, %v2001_v46  ;;  %v1998_v38 = vpop.xlane.xlu0 %1997 }
 0xe92   : > { %v2002_v39 = vmul.f32 0.015625, %v1998_v38 }
 0xe93   : > { %v2005_v41 = vadd.f32 1e-05, %v2003_v37 }
 0xe94   : > { %v2004_v42 = vadd.f32 1e-05, %v2002_v39 }
 0xe95   : > { %2846 = vrsqrt.f32 %v2005_v41 }
 0xe96   : > { %2848 = vrsqrt.f32 %v2004_v42 }
 0xe9f   : > { %v2847_v43 = vpop.eup %2846 }
 0xea0   : > { %v2849_v47 = vpop.eup %2848  ;;  %v2009_v48 = vmul.f32 %v2847_v43, %v1993_v30 }
 0xea1   : > { %v2008_v51 = vmul.f32 %v2849_v47, %v1992_v31  ;;  %2031 = sbr.rel (%p2325_p13) target bundleno = 3752 (0xea8), region = 88 }
 0xea2   : > { %v2017_v52 = vmul.f32 %v2323_v45, %v2009_v48 }
 0xea3   : > { %v2016_v53 = vmul.f32 %v2323_v45, %v2008_v51 }
 0xea4   : > { %v2025_v54 = vadd.f32 %v2324_v49, %v2017_v52 }
 0xea5   : > { %v2024_v55 = vadd.f32 %v2324_v49, %v2016_v53 }
 0xea6   : > { %2027 = vst.msk [vmem:[#allocation2 + $0x8] sm:$0xff] %vm725_vm1, %v2025_v54  ;;  %2033 = vst.msk [vmem:[%s3424_s21 + $0x8] sm:$0xff] (!%p2325_p13), %vm725_vm1, %v2025_v54 }
 0xea7   : > { %2026 = vst.msk [vmem:[#allocation2] sm:$0xff] %vm725_vm1, %v2024_v55  ;;  %2032 = vst.msk [vmem:[%s3424_s21] sm:$0xff] (!%p2325_p13), %vm725_vm1, %v2024_v55 }
 0xea8 PF: > { %s3828_s0 = sld [smem:[#allocation18_spill]]  ;;  %s3829_s11 = sld [smem:[#allocation28_spill]] }
 0xea9   : > { %s3830_s15 = sld [smem:[#allocation22_spill]]  ;;  %s3831_s13 = sld [smem:[#allocation41_spill]] }
 0xeaa   : > { %s2048_s7 = sshll.u32 %s3424_s21, 4  ;;  %s3050_s25 = smov [#allocation9]   ;;  %s3658_s7 = int_to_ptr.vmem [resolvable:$true] %s2048_s7 }
 0xeab   : > { %s2910_s12 = scalar_lea.vmem %s3658_s7, 256  ;;  %s2914_s5 = sshll.u32 %s3050_s25, 4  ;;  %s2915_s5 = int_to_ptr.vmem [resolvable:$false] %s2914_s5 }
 0xeac   : > { %p2911_p12 = scmp.ne.s32.totalorder %s3658_s7, %s2910_s12  ;;  %s2916_s20 = scalar_lea.vmem %s2915_s5, 512 }
 0xead   : > { %p2917_p1 = scmp.lt.s32.totalorder %s3658_s7, %s2915_s5  ;;  %p2918_p9 = scmp.lt.s32.totalorder %s2916_s20, %s2910_s12 }
 0xeae   : > { %s2336_s10 = sshll.u32 %s3828_s0, 8  ;;  %s2035_s14 = scalar_lea.sflag [#allocation6], %s3829_s11 }
 0xeaf   : > { %s3655_s22 = scalar_lea.hbm %s3831_s13, %s2336_s10  ;;  %p3832_p0 = scmp.ne.s32.totalorder %s3830_s15, 0 }
 0xeb0   : > { %p2919_p2 = por %p2918_p9, %p2917_p1 }
 0xeb1   : > { %p2912_p5 = pnand %p2911_p12, %p3832_p0 }
 0xeb3   : > { %p2913_p3 = pneg %p2912_p5 }
 0xeb5   : > { %p2920_p11 = pnand %p2919_p2, %p2913_p3 }
 0xeb7   : > { %2923 = shalt.err (!%p2920_p11)
}
 0xeb8   : > { %s2924_s21 = scalar_lea.hbm %s3655_s22, 256  ;;  %s2928_s18 = scalar_lea.hbm %s3831_s13, 512 }
 0xeb9   : > { %p2925_p7 = scmp.ne.s32.totalorder %s3655_s22, %s2924_s21  ;;  %p2929_p10 = scmp.lt.u32.totalorder %s3655_s22, %s3831_s13 }
 0xeba   : > { %p2930_p6 = scmp.lt.u32.totalorder %s2928_s18, %s2924_s21  ;;  %p2932_p12 = scmp.lt.u32.totalorder %s2924_s21, %s3655_s22 }
 0xebb   : > { %p2926_p4 = pnand %p2925_p7, %p3832_p0 }
 0xebc   : > { %p2931_p13 = por %p2930_p6, %p2929_p10 }
 0xebd   : > { %p2927_p8 = pneg %p2926_p4 }
 0xebe   : > { %p2933_p5 = por %p2932_p12, %p2931_p13 }
 0xec0   : > { %p2934_p3 = pnand %p2933_p5, %p2927_p8 }
 0xec2   : > { %2937 = shalt.err (!%p2934_p3)
}
 0xec3   : > { %s3051_s30 = smov 128   ;;  %s3052_s3 = smov 8  }
 0xec4   : > { %2660 = dma.vmem_to_hbm [thread:$0]  (%p3832_p0), %s3658_s7, 256, %s3655_s22, %s2035_s14, %s3051_s30, %s3051_s30, %s3052_s3  }
 0xec5 PF: > { %s3833_s1 = sld [smem:[#allocation21_spill]]  ;;  %s3834_s27 = sld [smem:[#allocation15_spill]] }
 0xec6   : > { %s3835_s26 = sld [smem:[#allocation23_spill]] }
 0xecb   : > { %p2674_p1 = scmp.ge.s32.totalorder %s3833_s1, 2  ;;  %s2063_s24 = sand.u32 1, %s3834_s27  }
 0xecc   : > { %p3836_p9 = scmp.ne.s32.totalorder %s3835_s26, 0  ;;  %s2064_s2 = scalar_lea.sflag [#allocation6], %s2063_s24 }
 0xece   : > { %p2670_p2 = pnand %p2674_p1, %p3836_p9 }
 0xed0   : > { %2991 = dma.done.wait (!%p2670_p2), %s2064_s2, 256  }
 0xed1   : > { %2993 = vsyncadd (!%p2670_p2), %s2064_s2, 4294967040  ;;  %s32_s18 = sadd.s32 1, %s3833_s1   ;;  %s3837_s25 = sld [smem:[#allocation13_spill]] }
 0xed2   : > { %p29_p11 = scmp.ge.s32.totalorder %s32_s18, 6   ;;  %s3838_s26 = sld [smem:[#allocation14_spill]] }
 0xed3   : > { %s3839_s27 = sld [smem:[#allocation26_spill]]  ;;  %s3840_s28 = sld [smem:[#allocation16_spill]] }
 0xed4   : > { %s3841_s29 = sld [smem:[#allocation17_spill]]  ;;  %s3842_s30 = sld [smem:[#allocation27_spill]] }
 0xed5   : > { %s3843_s14 = sld [smem:[#allocation19_spill]]  ;;  %s3844_s15 = sld [smem:[#allocation20_spill]] }
 0xed6   : > { %s3845_s16 = sld [smem:[#allocation24_spill]]  ;;  %s3846_s17 = sld [smem:[#allocation25_spill]] }
 0xed7   :  { %31 = sbr.rel (!%p29_p11) target bundleno = 25 (0x19), region = 171 }
 0xede   :  { %2069 = vsyncpa [#allocation5], 1 }
 0xedf   :  { %2071 = vsyncpa [#allocation5 + $0x1], 1 }
 0xee0   :  { %2072 = vsyncpa [#allocation8], 1 }
 0xee1   :  { %2074 = vsyncpa [#allocation8 + $0x1], 1 }
 0xee2   :  { %2075 = vsyncpa [#allocation6], 1 }
 0xee3   :  { %2077 = vsyncpa [#allocation6 + $0x1], 1 }

</bundles_post_ra>
